<compile_context>
chip_gen: v7x
topology: tpu7x:2x2x1
jax: 0.10.0
libtpu: 0.0.40
codegen_flags: <defaults>
</compile_context>

<pallas_src>
import functools

import jax
import jax.numpy as jnp
from jax.experimental import pallas as pl
from jax.experimental.pallas import tpu as pltpu


MAX_TILE_B = 4096  # cap per-tile rows; keeps VMEM use at a few MiB worst case


def policy_kernel(state_ref, w_obs_ref, b_obs_ref, w_head_ref, b_head_ref,
                  out_ref, *, obs_dim):
    """Fused Policy forward for one (TILE_B, ...) batch tile."""
    x = state_ref[...]                          # (TILE_B, obs_dim)
    w = w_obs_ref[...]                          # (obs_dim, H)

    # Shared layer: K = obs_dim is tiny, so do the contraction on the VPU as
    # obs_dim broadcast multiply-adds (statically unrolled). Bias starts the
    # accumulator and broadcasts up on the first add.
    h = b_obs_ref[...]                          # (1, H)
    for k in range(obs_dim):
        h = h + x[:, k:k + 1] * w[k:k + 1, :]   # (TILE_B, 1) * (1, H)
    h = jnp.tanh(h)                             # EUP

    # Fused actor+critic head: single lane-dense MXU matmul + unmasked store.
    out_ref[...] = (
        jnp.dot(h, w_head_ref[...], preferred_element_type=jnp.float32)
        + b_head_ref[...]                       # (1, 128) broadcast
    )


def prepare_policy_params(w_obs, b_obs, w_act, b_act, w_val, b_val,
                          head_pad=128):
    """One-time layout prep: transpose to (in, out), fuse heads, pad to 128 lanes.

    Weights come in PyTorch nn.Linear convention (out_features, in_features).
    Call this ONCE (e.g. after init / after each optimizer step), not per forward.
    """
    hidden = w_obs.shape[0]
    action_dim = w_act.shape[0]

    w_obs_t = jnp.transpose(w_obs).astype(jnp.float32)          # (obs_dim, H)
    b_obs_r = b_obs.reshape(1, hidden).astype(jnp.float32)      # (1, H)

    # Fused head: [W_act^T | W_val^T | 0-pad] -> (H, head_pad)
    w_head = jnp.concatenate(
        [jnp.transpose(w_act), jnp.transpose(w_val)], axis=1)   # (H, A+1)
    b_head = jnp.concatenate([b_act, b_val]).reshape(1, -1)     # (1, A+1)
    n_pad = head_pad - (action_dim + 1)
    w_head = jnp.pad(w_head, ((0, 0), (0, n_pad))).astype(jnp.float32)
    b_head = jnp.pad(b_head, ((0, 0), (0, n_pad))).astype(jnp.float32)

    return {
        "w_obs_t": w_obs_t,
        "b_obs_r": b_obs_r,
        "w_head": w_head,
        "b_head": b_head,
        "action_dim": int(action_dim),
    }


def _num_tensorcores():
    """Best-effort TensorCore count per chip (v7x has 2; earlier gens have 1)."""
    try:
        kind = jax.devices()[0].device_kind.lower()
    except Exception:
        return 1
    return 2 if ("v7" in kind or "7x" in kind) else 1


def policy_forward(state, params, *, num_cores=None):
    """state: (B, obs_dim) float32. Returns (action_logits (B, A), state_value (B, 1))."""
    state = state.astype(jnp.float32)
    B, obs_dim = state.shape
    A = int(params["action_dim"])
    H = params["w_obs_t"].shape[1]
    HEAD = params["w_head"].shape[1]

    # --- Small-batch fast path (e.g. select_action with B=1): launch + DMA +
    # slice overhead would dominate a Pallas call, so use fused XLA ops.
    if B < 64:
        h = jnp.tanh(state @ params["w_obs_t"] + params["b_obs_r"])
        compact = h @ params["w_head"][:, :A + 1] + params["b_head"][:, :A + 1]
        return compact[:, :A], compact[:, A:A + 1]

    # --- Generation-aware grid: one step per TensorCore (1 on v5e/v6e, 2 on
    # v7x so both cores get a tile), capped so a tile never exceeds MAX_TILE_B.
    if num_cores is None:
        num_cores = _num_tensorcores()
    n_steps = max(num_cores, pl.cdiv(B, MAX_TILE_B))
    tb = 8 * pl.cdiv(pl.cdiv(B, n_steps), 8)     # rows per tile, multiple of 8
    b_pad = tb * n_steps
    state_p = state if b_pad == B else jnp.pad(state, ((0, b_pad - B), (0, 0)))
    grid = (n_steps,)

    kernel = functools.partial(policy_kernel, obs_dim=obs_dim)

    # Advisory cost hint so XLA schedules/overlaps this tiny custom call well.
    cost = pl.CostEstimate(
        flops=2 * b_pad * obs_dim * H + 2 * b_pad * H * HEAD,
        transcendentals=b_pad * H,
        bytes_accessed=4 * (b_pad * obs_dim + obs_dim * H + H
                            + H * HEAD + HEAD + b_pad * HEAD),
    )

    fused = pl.pallas_call(
        kernel,
        out_shape=jax.ShapeDtypeStruct((b_pad, HEAD), jnp.float32),
        grid=grid,
        in_specs=[
            pl.BlockSpec((tb, obs_dim), lambda i: (i, 0)),   # state tile per grid step
            pl.BlockSpec((obs_dim, H), lambda i: (0, 0)),    # weights resident across grid
            pl.BlockSpec((1, H), lambda i: (0, 0)),
            pl.BlockSpec((H, HEAD), lambda i: (0, 0)),
            pl.BlockSpec((1, HEAD), lambda i: (0, 0)),
        ],
        out_specs=pl.BlockSpec((tb, HEAD), lambda i: (i, 0)),
        compiler_params=pltpu.CompilerParams(
            dimension_semantics=("parallel",)),              # shard B over TCs (v7x)
        cost_estimate=cost,
    )(state_p, params["w_obs_t"], params["b_obs_r"],
      params["w_head"], params["b_head"])

    # Single slice of the padded slab; the logits/value split then only touches
    # the tiny (B, A+1) compact array, not the (b_pad, 128) HBM slab twice.
    compact = jax.lax.slice(fused, (0, 0), (B, A + 1))
    action_logits = compact[:, :A]           # raw logits, matching Policy.forward
    state_value = compact[:, A:A + 1]        # (B, 1)
    return action_logits, state_value


if __name__ == "__main__":
    # CartPole-like env (as implied by the module): obs_dim=4, discrete
    # action_dim=2, hidden=128. Batched B so the kernel isn't pure launch overhead.
    B, OBS_DIM, HIDDEN, ACTION_DIM = 512, 4, 128, 2

    key = jax.random.PRNGKey(0)
    k_state, k_wo, k_bo, k_wa, k_ba, k_wv, k_bv = jax.random.split(key, 7)

    state = jax.random.normal(k_state, (B, OBS_DIM), dtype=jnp.float32)

    # Weight init mirrors the module: randn * 1/sqrt(in_features);
    # biases use nn.Linear default uniform(-1/sqrt(in), 1/sqrt(in)).
    def init_linear(kw, kb, in_f, out_f):
        scale = 1.0 / jnp.sqrt(jnp.float32(in_f))
        w = jax.random.normal(kw, (out_f, in_f), dtype=jnp.float32) * scale
        b = jax.random.uniform(kb, (out_f,), dtype=jnp.float32,
                               minval=-scale, maxval=scale)
        return w, b

    w_obs, b_obs = init_linear(k_wo, k_bo, OBS_DIM, HIDDEN)      # (128, 4), (128,)
    w_act, b_act = init_linear(k_wa, k_ba, HIDDEN, ACTION_DIM)   # (2, 128), (2,)
    w_val, b_val = init_linear(k_wv, k_bv, HIDDEN, 1)            # (1, 128), (1,)

    # One-time layout prep (NOT per step).
    params = prepare_policy_params(w_obs, b_obs, w_act, b_act, w_val, b_val)

    # Pallas path (B >= 64).
    action_logits, state_value = policy_forward(state, params)
    jax.block_until_ready((action_logits, state_value))

    # Pure-JAX reference (matches Policy.forward: raw logits, no softmax).
    h_ref = jnp.tanh(state @ w_obs.T + b_obs)
    act_ref = h_ref @ w_act.T + b_act
    val_ref = h_ref @ w_val.T + b_val

    assert action_logits.shape == (B, ACTION_DIM)
    assert state_value.shape == (B, 1)
    assert jnp.allclose(action_logits, act_ref, atol=1e-5, rtol=1e-5)
    assert jnp.allclose(state_value, val_ref, atol=1e-5, rtol=1e-5)

    # Small-batch fast path (select_action-style B=1) must match too.
    a1, v1 = policy_forward(state[:1], params)
    jax.block_until_ready((a1, v1))
    assert jnp.allclose(a1, act_ref[:1], atol=1e-5, rtol=1e-5)
    assert jnp.allclose(v1, val_ref[:1], atol=1e-5, rtol=1e-5)

    print("KERNEL_OK")
</pallas_src>

<mosaic_0001>
module attributes {stable_mosaic.version = 11 : i64} {
  func.func @policy_kernel(%arg0: i32, %arg1: memref<512x4xf32, #tpu.memory_space<vmem>>, %arg2: memref<4x128xf32, #tpu.memory_space<vmem>>, %arg3: memref<1x128xf32, #tpu.memory_space<vmem>>, %arg4: memref<128x128xf32, #tpu.memory_space<vmem>>, %arg5: memref<1x128xf32, #tpu.memory_space<vmem>>, %arg6: memref<512x128xf32, #tpu.memory_space<vmem>>) attributes {dimension_semantics = [#tpu.dimension_semantics<parallel>], iteration_bounds = array<i64: 1>, scalar_prefetch = 0 : i64, scratch_operands = 0 : i64, tpu.core_type = #tpu.core_type<tc>, window_params = [{transform_indices = @transform_0, window_bounds = array<i64: 512, 4>}, {pipeline_mode = #tpu.pipeline_mode<synchronous>, transform_indices = @transform_1, window_bounds = array<i64: 4, 128>}, {pipeline_mode = #tpu.pipeline_mode<synchronous>, transform_indices = @transform_2, window_bounds = array<i64: 1, 128>}, {pipeline_mode = #tpu.pipeline_mode<synchronous>, transform_indices = @transform_3, window_bounds = array<i64: 128, 128>}, {pipeline_mode = #tpu.pipeline_mode<synchronous>, transform_indices = @transform_4, window_bounds = array<i64: 1, 128>}, {transform_indices = @transform_5, window_bounds = array<i64: 512, 128>}]} {
    %c0 = arith.constant 0 : index
    %c0_0 = arith.constant 0 : index
    %0 = vector.load %arg1[%c0, %c0_0] : memref<512x4xf32, #tpu.memory_space<vmem>>, vector<512x4xf32>
    %c0_1 = arith.constant 0 : index
    %c0_2 = arith.constant 0 : index
    %1 = vector.load %arg2[%c0_1, %c0_2] : memref<4x128xf32, #tpu.memory_space<vmem>>, vector<4x128xf32>
    %c0_3 = arith.constant 0 : index
    %c0_4 = arith.constant 0 : index
    %2 = vector.load %arg3[%c0_3, %c0_4] : memref<1x128xf32, #tpu.memory_space<vmem>>, vector<1x128xf32>
    %3 = vector.extract_strided_slice %0 {offsets = [0, 0], sizes = [512, 1], strides = [1, 1]} : vector<512x4xf32> to vector<512x1xf32>
    %4 = vector.extract_strided_slice %1 {offsets = [0, 0], sizes = [1, 128], strides = [1, 1]} : vector<4x128xf32> to vector<1x128xf32>
    %5 = vector.broadcast %3 : vector<512x1xf32> to vector<512x128xf32>
    %6 = vector.broadcast %4 : vector<1x128xf32> to vector<512x128xf32>
    %7 = arith.mulf %5, %6 : vector<512x128xf32>
    %8 = vector.broadcast %2 : vector<1x128xf32> to vector<512x128xf32>
    %9 = arith.addf %8, %7 : vector<512x128xf32>
    %10 = vector.extract_strided_slice %0 {offsets = [0, 1], sizes = [512, 1], strides = [1, 1]} : vector<512x4xf32> to vector<512x1xf32>
    %11 = vector.extract_strided_slice %1 {offsets = [1, 0], sizes = [1, 128], strides = [1, 1]} : vector<4x128xf32> to vector<1x128xf32>
    %12 = vector.broadcast %10 : vector<512x1xf32> to vector<512x128xf32>
    %13 = vector.broadcast %11 : vector<1x128xf32> to vector<512x128xf32>
    %14 = arith.mulf %12, %13 : vector<512x128xf32>
    %15 = arith.addf %9, %14 : vector<512x128xf32>
    %16 = vector.extract_strided_slice %0 {offsets = [0, 2], sizes = [512, 1], strides = [1, 1]} : vector<512x4xf32> to vector<512x1xf32>
    %17 = vector.extract_strided_slice %1 {offsets = [2, 0], sizes = [1, 128], strides = [1, 1]} : vector<4x128xf32> to vector<1x128xf32>
    %18 = vector.broadcast %16 : vector<512x1xf32> to vector<512x128xf32>
    %19 = vector.broadcast %17 : vector<1x128xf32> to vector<512x128xf32>
    %20 = arith.mulf %18, %19 : vector<512x128xf32>
    %21 = arith.addf %15, %20 : vector<512x128xf32>
    %22 = vector.extract_strided_slice %0 {offsets = [0, 3], sizes = [512, 1], strides = [1, 1]} : vector<512x4xf32> to vector<512x1xf32>
    %23 = vector.extract_strided_slice %1 {offsets = [3, 0], sizes = [1, 128], strides = [1, 1]} : vector<4x128xf32> to vector<1x128xf32>
    %24 = vector.broadcast %22 : vector<512x1xf32> to vector<512x128xf32>
    %25 = vector.broadcast %23 : vector<1x128xf32> to vector<512x128xf32>
    %26 = arith.mulf %24, %25 : vector<512x128xf32>
    %27 = arith.addf %21, %26 : vector<512x128xf32>
    %28 = math.tanh %27 : vector<512x128xf32>
    %c0_5 = arith.constant 0 : index
    %c0_6 = arith.constant 0 : index
    %29 = vector.load %arg4[%c0_5, %c0_6] : memref<128x128xf32, #tpu.memory_space<vmem>>, vector<128x128xf32>
    %cst = arith.constant dense<0.000000e+00> : vector<512x128xf32>
    %30 = tpu.matmul %28, %29, %cst {dimension_numbers = #tpu.dot_dimension_numbers<[1], [0], [0], [1], [0, 0, 1, 1], [], []>} : vector<512x128xf32>, vector<128x128xf32>, vector<512x128xf32> -> vector<512x128xf32>
    %c0_7 = arith.constant 0 : index
    %c0_8 = arith.constant 0 : index
    %31 = vector.load %arg5[%c0_7, %c0_8] : memref<1x128xf32, #tpu.memory_space<vmem>>, vector<1x128xf32>
    %32 = vector.broadcast %31 : vector<1x128xf32> to vector<512x128xf32>
    %33 = arith.addf %30, %32 : vector<512x128xf32>
    %c0_9 = arith.constant 0 : index
    %c0_10 = arith.constant 0 : index
    %34 = vector.load %arg6[%c0_9, %c0_10] : memref<512x128xf32, #tpu.memory_space<vmem>>, vector<512x128xf32>
    tpu.vector_store %arg6[%c0_9, %c0_10], %33 {strides = array<i32>} : memref<512x128xf32, #tpu.memory_space<vmem>>, vector<512x128xf32>,
    return
  }
  func.func @transform_0(%arg0: i32) -> (i32, i32) {
    %c0_i32 = arith.constant 0 : i32
    %c0_i32_0 = arith.constant 0 : i32
    return %arg0, %c0_i32 : i32, i32
  }
  func.func @transform_1(%arg0: i32) -> (i32, i32) {
    %c0_i32 = arith.constant 0 : i32
    %c0_i32_0 = arith.constant 0 : i32
    %c0_i32_1 = arith.constant 0 : i32
    return %c0_i32, %c0_i32_0 : i32, i32
  }
  func.func @transform_2(%arg0: i32) -> (i32, i32) {
    %c0_i32 = arith.constant 0 : i32
    %c0_i32_0 = arith.constant 0 : i32
    %c0_i32_1 = arith.constant 0 : i32
    return %c0_i32, %c0_i32_0 : i32, i32
  }
  func.func @transform_3(%arg0: i32) -> (i32, i32) {
    %c0_i32 = arith.constant 0 : i32
    %c0_i32_0 = arith.constant 0 : i32
    %c0_i32_1 = arith.constant 0 : i32
    return %c0_i32, %c0_i32_0 : i32, i32
  }
  func.func @transform_4(%arg0: i32) -> (i32, i32) {
    %c0_i32 = arith.constant 0 : i32
    %c0_i32_0 = arith.constant 0 : i32
    %c0_i32_1 = arith.constant 0 : i32
    return %c0_i32, %c0_i32_0 : i32, i32
  }
  func.func @transform_5(%arg0: i32) -> (i32, i32) {
    %c0_i32 = arith.constant 0 : i32
    %c0_i32_0 = arith.constant 0 : i32
    return %arg0, %c0_i32 : i32, i32
  }
}

</mosaic_0001>

<bundles_post_ra>
// kernel: tpu_custom_call.1
= control target key start
LH: loop header
LB: loop body
LE: loop exit
PB: predicated region body
PF: predicated region fallthrough
CT: control target
= control target key end

     0   :  { %v2729_v2 = vmov 0   ;;  %s4489_s0 = inlined_call_operand.vmem [shape: f32[512,4], index: 0, kind: input, shape index: {}]   ;;  %s4490_s1 = inlined_call_operand.vmem [shape: f32[4,128], index: 1, kind: input, shape index: {}]   ;;  %s4491_s2 = inlined_call_operand.vmem [shape: f32[1,128], index: 2, kind: input, shape index: {}]   ;;  %s4492_s3 = inlined_call_operand.vmem [shape: f32[128,128], index: 3, kind: input, shape index: {}]   ;;  %s4493_s4 = inlined_call_operand.vmem [shape: f32[1,128], index: 4, kind: input, shape index: {}]   ;;  %s4494_s5 = inlined_call_operand.hbm [shape: f32[512,128], index: 5, kind: output, shape index: {}]  }
   0x1   :  { %v2769_v0 = vld [vmem:[%s4489_s0 + $0x10] sm:$0xff]  ;;  %v2774_v1 = vld [vmem:[%s4489_s0] sm:$0xff]  ;;  %2527 = vset.pattern.permute.xlu1 %v2729_v2  ;;  %2526 = vset.pattern.permute.xlu0 %v2729_v2  ;;  %v2781_v3 = vld [vmem:[%s4489_s0 + $0x18] sm:$0xff] }
   0x2   :  { %99 = vperm.xlu1 %2527, %v2769_v0   ;;  %89 = vperm.xlu0 %2526, %v2774_v1   ;;  %v2786_v4 = vld [vmem:[%s4489_s0 + $0x8] sm:$0xff]  ;;  %v2798_v6 = vld [vmem:[%s4489_s0 + $0x20] sm:$0xff]  ;;  %v2805_v7 = vld [vmem:[%s4489_s0 + $0x38] sm:$0xff] }
   0x3   :  { %v2793_v5 = vld [vmem:[%s4489_s0 + $0x28] sm:$0xff]  ;;  %v2810_v8 = vld [vmem:[%s4489_s0 + $0x30] sm:$0xff]  ;;  %v2822_v10 = vld [vmem:[%s4489_s0 + $0x40] sm:$0xff] }
   0x4   :  { %v2817_v9 = vld [vmem:[%s4489_s0 + $0x48] sm:$0xff]  ;;  %v2829_v11 = vld [vmem:[%s4489_s0 + $0x58] sm:$0xff]  ;;  %v2834_v12 = vld [vmem:[%s4489_s0 + $0x50] sm:$0xff] }
   0x6   :  { %104 = vperm.xlu1 %2527, %v2781_v3   ;;  %94 = vperm.xlu0 %2526, %v2786_v4  }
   0xa   :  { %114 = vperm.xlu1 %2527, %v2793_v5   ;;  %109 = vperm.xlu0 %2526, %v2798_v6  }
   0xe   :  { %124 = vperm.xlu1 %2527, %v2805_v7   ;;  %119 = vperm.xlu0 %2526, %v2810_v8  }
  0x12   :  { %134 = vperm.xlu1 %2527, %v2817_v9   ;;  %129 = vperm.xlu0 %2526, %v2822_v10  }
  0x16   :  { %144 = vperm.xlu1 %2527, %v2829_v11   ;;  %139 = vperm.xlu0 %2526, %v2834_v12  }
  0x17   :  { %10 = vsyncpa [#allocation3], 0  ;;  %v2841_v13 = vld [vmem:[%s4489_s0 + $0x68] sm:$0xff]  ;;  %v2846_v14 = vld [vmem:[%s4489_s0 + $0x60] sm:$0xff] }
  0x18   :  { %v2853_v15 = vld [vmem:[%s4489_s0 + $0x78] sm:$0xff]  ;;  %v2858_v16 = vld [vmem:[%s4489_s0 + $0x70] sm:$0xff]  ;;  %v2865_v17 = vld [vmem:[%s4489_s0 + $0x88] sm:$0xff] }
  0x19   :  { %v2870_v18 = vld [vmem:[%s4489_s0 + $0x80] sm:$0xff]  ;;  %v2877_v19 = vld [vmem:[%s4489_s0 + $0x98] sm:$0xff]  ;;  %v2882_v20 = vld [vmem:[%s4489_s0 + $0x90] sm:$0xff] }
  0x1a   :  { %154 = vperm.xlu1 %2527, %v2841_v13   ;;  %149 = vperm.xlu0 %2526, %v2846_v14   ;;  %v2889_v21 = vld [vmem:[%s4489_s0 + $0xa8] sm:$0xff]  ;;  %v2894_v22 = vld [vmem:[%s4489_s0 + $0xa0] sm:$0xff]  ;;  %v2901_v23 = vld [vmem:[%s4489_s0 + $0xb8] sm:$0xff] }
  0x1b   :  { %v2906_v24 = vld [vmem:[%s4489_s0 + $0xb0] sm:$0xff]  ;;  %v2913_v25 = vld [vmem:[%s4489_s0 + $0xc8] sm:$0xff]  ;;  %v2918_v26 = vld [vmem:[%s4489_s0 + $0xc0] sm:$0xff] }
  0x1c   :  { %v2925_v27 = vld [vmem:[%s4489_s0 + $0xd8] sm:$0xff]  ;;  %v2930_v28 = vld [vmem:[%s4489_s0 + $0xd0] sm:$0xff]  ;;  %v2937_v29 = vld [vmem:[%s4489_s0 + $0xe8] sm:$0xff] }
  0x1d   :  { %v2942_v30 = vld [vmem:[%s4489_s0 + $0xe0] sm:$0xff]  ;;  %v2949_v31 = vld [vmem:[%s4489_s0 + $0xf8] sm:$0xff]  ;;  %v2954_v32 = vld [vmem:[%s4489_s0 + $0xf0] sm:$0xff] }
  0x1e   :  { %164 = vperm.xlu1 %2527, %v2853_v15   ;;  %159 = vperm.xlu0 %2526, %v2858_v16   ;;  %v2961_v33 = vld [vmem:[%s4489_s0 + $0x108] sm:$0xff]  ;;  %v2966_v34 = vld [vmem:[%s4489_s0 + $0x100] sm:$0xff]  ;;  %v2973_v35 = vld [vmem:[%s4489_s0 + $0x118] sm:$0xff] }
  0x1f   :  { %v2978_v36 = vld [vmem:[%s4489_s0 + $0x110] sm:$0xff]  ;;  %v2985_v37 = vld [vmem:[%s4489_s0 + $0x128] sm:$0xff]  ;;  %v2990_v38 = vld [vmem:[%s4489_s0 + $0x120] sm:$0xff] }
  0x20   :  { %v2997_v39 = vld [vmem:[%s4489_s0 + $0x138] sm:$0xff]  ;;  %v3002_v40 = vld [vmem:[%s4489_s0 + $0x130] sm:$0xff]  ;;  %v3009_v41 = vld [vmem:[%s4489_s0 + $0x148] sm:$0xff] }
  0x21   :  { %v3014_v42 = vld [vmem:[%s4489_s0 + $0x140] sm:$0xff]  ;;  %v3021_v43 = vld [vmem:[%s4489_s0 + $0x158] sm:$0xff]  ;;  %v3026_v44 = vld [vmem:[%s4489_s0 + $0x150] sm:$0xff] }
  0x22   :  { %174 = vperm.xlu1 %2527, %v2865_v17   ;;  %169 = vperm.xlu0 %2526, %v2870_v18   ;;  %v3033_v45 = vld [vmem:[%s4489_s0 + $0x168] sm:$0xff]  ;;  %v3038_v46 = vld [vmem:[%s4489_s0 + $0x160] sm:$0xff]  ;;  %v3045_v47 = vld [vmem:[%s4489_s0 + $0x178] sm:$0xff] }
  0x23   :  { %v3050_v48 = vld [vmem:[%s4489_s0 + $0x170] sm:$0xff]  ;;  %v3057_v49 = vld [vmem:[%s4489_s0 + $0x188] sm:$0xff]  ;;  %v3062_v50 = vld [vmem:[%s4489_s0 + $0x180] sm:$0xff] }
  0x24   :  { %4521 = vst [vmem:[#allocation5_spill] sm:$0xff] %v3050_v48  ;;  %4522 = vst [vmem:[#allocation6_spill] sm:$0xff] %v3062_v50  ;;  %v3069_v51 = vld [vmem:[%s4489_s0 + $0x198] sm:$0xff]  ;;  %v3074_v52 = vld [vmem:[%s4489_s0 + $0x190] sm:$0xff] }
  0x25   :  { %4523 = vst [vmem:[#allocation7_spill] sm:$0xff] %v3074_v52  ;;  %v3081_v53 = vld [vmem:[%s4489_s0 + $0x1a8] sm:$0xff]  ;;  %v3086_v54 = vld [vmem:[%s4489_s0 + $0x1a0] sm:$0xff]  ;;  %v3093_v55 = vld [vmem:[%s4489_s0 + $0x1b8] sm:$0xff] }
  0x26   :  { %184 = vperm.xlu1 %2527, %v2877_v19   ;;  %179 = vperm.xlu0 %2526, %v2882_v20   ;;  %4524 = vst [vmem:[#allocation8_spill] sm:$0xff] %v3086_v54  ;;  %v3098_v56 = vld [vmem:[%s4489_s0 + $0x1b0] sm:$0xff]  ;;  %v3105_v57 = vld [vmem:[%s4489_s0 + $0x1c8] sm:$0xff]  ;;  %v3110_v58 = vld [vmem:[%s4489_s0 + $0x1c0] sm:$0xff] }
  0x27   :  { %4525 = vst [vmem:[#allocation9_spill] sm:$0xff] %v3105_v57  ;;  %v3117_v59 = vld [vmem:[%s4489_s0 + $0x1d8] sm:$0xff]  ;;  %v3122_v60 = vld [vmem:[%s4489_s0 + $0x1d0] sm:$0xff]  ;;  %v3129_v61 = vld [vmem:[%s4489_s0 + $0x1e8] sm:$0xff] }
  0x28   :  { %4526 = vst [vmem:[#allocation10_spill] sm:$0xff] %v3117_v59  ;;  %4527 = vst [vmem:[#allocation11_spill] sm:$0xff] %v3122_v60  ;;  %v3134_v62 = vld [vmem:[%s4489_s0 + $0x1e0] sm:$0xff]  ;;  %v3141_v63 = vld [vmem:[%s4489_s0 + $0x1f8] sm:$0xff] }
  0x29   :  { %4528 = vst [vmem:[#allocation12_spill] sm:$0xff] %v3129_v61  ;;  %4529 = vst [vmem:[#allocation13_spill] sm:$0xff] %v3134_v62  ;;  %v3146_v2 = vld [vmem:[%s4489_s0 + $0x1f0] sm:$0xff] }
  0x2a   :  { %194 = vperm.xlu1 %2527, %v2889_v21   ;;  %189 = vperm.xlu0 %2526, %v2894_v22   ;;  %4530 = vst [vmem:[#allocation14_spill] sm:$0xff] %v3141_v63 }
  0x2e   :  { %204 = vperm.xlu1 %2527, %v2901_v23   ;;  %199 = vperm.xlu0 %2526, %v2906_v24  }
  0x32   :  { %214 = vperm.xlu1 %2527, %v2913_v25   ;;  %209 = vperm.xlu0 %2526, %v2918_v26  }
  0x36   :  { %224 = vperm.xlu1 %2527, %v2925_v27   ;;  %219 = vperm.xlu0 %2526, %v2930_v28  }
  0x3a   :  { %234 = vperm.xlu1 %2527, %v2937_v29   ;;  %229 = vperm.xlu0 %2526, %v2942_v30  }
  0x3e   :  { %244 = vperm.xlu1 %2527, %v2949_v31   ;;  %239 = vperm.xlu0 %2526, %v2954_v32  }
  0x42   :  { %254 = vperm.xlu1 %2527, %v2961_v33   ;;  %249 = vperm.xlu0 %2526, %v2966_v34  }
  0x46   :  { %264 = vperm.xlu1 %2527, %v2973_v35   ;;  %259 = vperm.xlu0 %2526, %v2978_v36  }
  0x4a   :  { %274 = vperm.xlu1 %2527, %v2985_v37   ;;  %269 = vperm.xlu0 %2526, %v2990_v38  }
  0x4e   :  { %284 = vperm.xlu1 %2527, %v2997_v39   ;;  %279 = vperm.xlu0 %2526, %v3002_v40  }
  0x52   :  { %294 = vperm.xlu1 %2527, %v3009_v41   ;;  %289 = vperm.xlu0 %2526, %v3014_v42  }
  0x56   :  { %304 = vperm.xlu1 %2527, %v3021_v43   ;;  %299 = vperm.xlu0 %2526, %v3026_v44  }
  0x5a   :  { %314 = vperm.xlu1 %2527, %v3033_v45   ;;  %309 = vperm.xlu0 %2526, %v3038_v46  }
  0x5e   :  { %324 = vperm.xlu1 %2527, %v3045_v47   ;;  %319 = vperm.xlu0 %2526, %v3050_v48  }
  0x62   :  { %334 = vperm.xlu1 %2527, %v3057_v49   ;;  %329 = vperm.xlu0 %2526, %v3062_v50  }
  0x66   :  { %344 = vperm.xlu1 %2527, %v3069_v51   ;;  %339 = vperm.xlu0 %2526, %v3074_v52  }
  0x6a   :  { %354 = vperm.xlu1 %2527, %v3081_v53   ;;  %349 = vperm.xlu0 %2526, %v3086_v54  }
  0x6e   :  { %364 = vperm.xlu1 %2527, %v3093_v55   ;;  %359 = vperm.xlu0 %2526, %v3098_v56  }
  0x72   :  { %374 = vperm.xlu1 %2527, %v3105_v57   ;;  %369 = vperm.xlu0 %2526, %v3110_v58  }
  0x76   :  { %384 = vperm.xlu1 %2527, %v3117_v59   ;;  %379 = vperm.xlu0 %2526, %v3122_v60  }
  0x7a   :  { %394 = vperm.xlu1 %2527, %v3129_v61   ;;  %389 = vperm.xlu0 %2526, %v3134_v62   ;;  %v2730_v61 = vmov 1  }
  0x7e   :  { %404 = vperm.xlu1 %2527, %v3141_v63   ;;  %399 = vperm.xlu0 %2526, %v3146_v2  }
  0x81   :  { %v3150_v59 = vpop.permute.xlu1 %99  ;;  %v3152_v60 = vpop.permute.xlu0 %89 }
  0x82   :  { %4531 = vst [vmem:[#allocation15_spill] sm:$0xff] %v3150_v59  ;;  %4532 = vst [vmem:[#allocation16_spill] sm:$0xff] %v3152_v60  ;;  %2529 = vset.pattern.permute.xlu1 %v2730_v61  ;;  %2528 = vset.pattern.permute.xlu0 %v2730_v61 }
  0x83   :  { %550 = vperm.xlu1 %2529, %v2786_v4   ;;  %546 = vperm.xlu0 %2528, %v2774_v1  }
  0x85   :  { %v3156_v62 = vpop.permute.xlu1 %104  ;;  %v3158_v57 = vpop.permute.xlu0 %94 }
  0x86   :  { %4533 = vst [vmem:[#allocation17_spill] sm:$0xff] %v3156_v62  ;;  %4534 = vst [vmem:[#allocation18_spill] sm:$0xff] %v3158_v57 }
  0x87   :  { %554 = vperm.xlu1 %2529, %v2769_v0   ;;  %558 = vperm.xlu0 %2528, %v2781_v3  }
  0x89   :  { %v3162_v63 = vpop.permute.xlu1 %114  ;;  %v3164_v59 = vpop.permute.xlu0 %109 }
  0x8a   :  { %4535 = vst [vmem:[#allocation19_spill] sm:$0xff] %v3162_v63  ;;  %4536 = vst [vmem:[#allocation20_spill] sm:$0xff] %v3164_v59 }
  0x8b   :  { %562 = vperm.xlu1 %2529, %v2798_v6   ;;  %566 = vperm.xlu0 %2528, %v2793_v5  }
  0x8d   :  { %v3168_v61 = vpop.permute.xlu1 %124  ;;  %v3170_v60 = vpop.permute.xlu0 %119 }
  0x8e   :  { %4537 = vst [vmem:[#allocation21_spill] sm:$0xff] %v3168_v61  ;;  %4538 = vst [vmem:[#allocation22_spill] sm:$0xff] %v3170_v60 }
  0x8f   :  { %570 = vperm.xlu1 %2529, %v2810_v8   ;;  %574 = vperm.xlu0 %2528, %v2805_v7  }
  0x91   :  { %v3174_v62 = vpop.permute.xlu1 %134  ;;  %v3176_v57 = vpop.permute.xlu0 %129 }
  0x92   :  { %4539 = vst [vmem:[#allocation23_spill] sm:$0xff] %v3174_v62  ;;  %4540 = vst [vmem:[#allocation24_spill] sm:$0xff] %v3176_v57 }
  0x93   :  { %578 = vperm.xlu1 %2529, %v2822_v10   ;;  %582 = vperm.xlu0 %2528, %v2817_v9  }
  0x95   :  { %v3180_v59 = vpop.permute.xlu1 %144  ;;  %v3182_v63 = vpop.permute.xlu0 %139 }
  0x96   :  { %4541 = vst [vmem:[#allocation25_spill] sm:$0xff] %v3180_v59  ;;  %4542 = vst [vmem:[#allocation26_spill] sm:$0xff] %v3182_v63 }
  0x97   :  { %586 = vperm.xlu1 %2529, %v2834_v12   ;;  %590 = vperm.xlu0 %2528, %v2829_v11  }
  0x99   :  { %v3186_v60 = vpop.permute.xlu1 %154  ;;  %v3188_v61 = vpop.permute.xlu0 %149 }
  0x9a   :  { %4543 = vst [vmem:[#allocation27_spill] sm:$0xff] %v3186_v60  ;;  %4544 = vst [vmem:[#allocation28_spill] sm:$0xff] %v3188_v61 }
  0x9b   :  { %594 = vperm.xlu1 %2529, %v2846_v14   ;;  %598 = vperm.xlu0 %2528, %v2841_v13  }
  0x9d   :  { %v3192_v57 = vpop.permute.xlu1 %164  ;;  %v3194_v62 = vpop.permute.xlu0 %159 }
  0x9e   :  { %4545 = vst [vmem:[#allocation29_spill] sm:$0xff] %v3192_v57  ;;  %4546 = vst [vmem:[#allocation30_spill] sm:$0xff] %v3194_v62 }
  0x9f   :  { %602 = vperm.xlu1 %2529, %v2858_v16   ;;  %606 = vperm.xlu0 %2528, %v2853_v15  }
  0xa1   :  { %v3198_v59 = vpop.permute.xlu1 %174  ;;  %v3200_v63 = vpop.permute.xlu0 %169 }
  0xa2   :  { %4547 = vst [vmem:[#allocation31_spill] sm:$0xff] %v3198_v59  ;;  %4548 = vst [vmem:[#allocation32_spill] sm:$0xff] %v3200_v63 }
  0xa3   :  { %610 = vperm.xlu1 %2529, %v2870_v18   ;;  %614 = vperm.xlu0 %2528, %v2865_v17  }
  0xa5   :  { %v3204_v61 = vpop.permute.xlu1 %184  ;;  %v3206_v60 = vpop.permute.xlu0 %179 }
  0xa6   :  { %4549 = vst [vmem:[#allocation33_spill] sm:$0xff] %v3204_v61  ;;  %4550 = vst [vmem:[#allocation34_spill] sm:$0xff] %v3206_v60 }
  0xa7   :  { %618 = vperm.xlu1 %2529, %v2882_v20   ;;  %622 = vperm.xlu0 %2528, %v2877_v19  }
  0xa9   :  { %v3210_v62 = vpop.permute.xlu1 %194  ;;  %v3212_v57 = vpop.permute.xlu0 %189 }
  0xaa   :  { %4551 = vst [vmem:[#allocation35_spill] sm:$0xff] %v3210_v62  ;;  %4552 = vst [vmem:[#allocation36_spill] sm:$0xff] %v3212_v57 }
  0xab   :  { %626 = vperm.xlu1 %2529, %v2894_v22   ;;  %630 = vperm.xlu0 %2528, %v2889_v21  }
  0xad   :  { %v3216_v63 = vpop.permute.xlu1 %204  ;;  %v3218_v59 = vpop.permute.xlu0 %199 }
  0xae   :  { %4553 = vst [vmem:[#allocation37_spill] sm:$0xff] %v3216_v63  ;;  %4554 = vst [vmem:[#allocation38_spill] sm:$0xff] %v3218_v59 }
  0xaf   :  { %634 = vperm.xlu1 %2529, %v2906_v24   ;;  %638 = vperm.xlu0 %2528, %v2901_v23  }
  0xb1   :  { %v3222_v60 = vpop.permute.xlu1 %214  ;;  %v3224_v61 = vpop.permute.xlu0 %209 }
  0xb2   :  { %4555 = vst [vmem:[#allocation39_spill] sm:$0xff] %v3222_v60  ;;  %4556 = vst [vmem:[#allocation40_spill] sm:$0xff] %v3224_v61 }
  0xb3   :  { %642 = vperm.xlu1 %2529, %v2918_v26   ;;  %646 = vperm.xlu0 %2528, %v2913_v25  }
  0xb5   :  { %v3228_v57 = vpop.permute.xlu1 %224  ;;  %v3230_v62 = vpop.permute.xlu0 %219 }
  0xb6   :  { %4557 = vst [vmem:[#allocation41_spill] sm:$0xff] %v3228_v57  ;;  %4558 = vst [vmem:[#allocation42_spill] sm:$0xff] %v3230_v62 }
  0xb7   :  { %650 = vperm.xlu1 %2529, %v2930_v28   ;;  %654 = vperm.xlu0 %2528, %v2925_v27  }
  0xb9   :  { %v3234_v59 = vpop.permute.xlu1 %234  ;;  %v3236_v63 = vpop.permute.xlu0 %229 }
  0xba   :  { %4559 = vst [vmem:[#allocation43_spill] sm:$0xff] %v3234_v59  ;;  %4560 = vst [vmem:[#allocation44_spill] sm:$0xff] %v3236_v63 }
  0xbb   :  { %658 = vperm.xlu1 %2529, %v2942_v30   ;;  %662 = vperm.xlu0 %2528, %v2937_v29  }
  0xbd   :  { %v3240_v61 = vpop.permute.xlu1 %244  ;;  %v3242_v60 = vpop.permute.xlu0 %239 }
  0xbe   :  { %4561 = vst [vmem:[#allocation45_spill] sm:$0xff] %v3240_v61  ;;  %4562 = vst [vmem:[#allocation46_spill] sm:$0xff] %v3242_v60 }
  0xbf   :  { %666 = vperm.xlu1 %2529, %v2954_v32   ;;  %670 = vperm.xlu0 %2528, %v2949_v31  }
  0xc1   :  { %v3246_v62 = vpop.permute.xlu1 %254  ;;  %v3248_v57 = vpop.permute.xlu0 %249 }
  0xc2   :  { %4563 = vst [vmem:[#allocation47_spill] sm:$0xff] %v3246_v62  ;;  %4564 = vst [vmem:[#allocation48_spill] sm:$0xff] %v3248_v57 }
  0xc3   :  { %674 = vperm.xlu1 %2529, %v2966_v34   ;;  %678 = vperm.xlu0 %2528, %v2961_v33  }
  0xc5   :  { %v3252_v63 = vpop.permute.xlu1 %264  ;;  %v3254_v59 = vpop.permute.xlu0 %259 }
  0xc6   :  { %4565 = vst [vmem:[#allocation49_spill] sm:$0xff] %v3252_v63  ;;  %4566 = vst [vmem:[#allocation50_spill] sm:$0xff] %v3254_v59 }
  0xc7   :  { %682 = vperm.xlu1 %2529, %v2978_v36   ;;  %686 = vperm.xlu0 %2528, %v2973_v35  }
  0xc9   :  { %v3258_v60 = vpop.permute.xlu1 %274  ;;  %v3260_v61 = vpop.permute.xlu0 %269 }
  0xca   :  { %4567 = vst [vmem:[#allocation51_spill] sm:$0xff] %v3258_v60  ;;  %4568 = vst [vmem:[#allocation52_spill] sm:$0xff] %v3260_v61 }
  0xcb   :  { %690 = vperm.xlu1 %2529, %v2990_v38   ;;  %694 = vperm.xlu0 %2528, %v2985_v37  }
  0xcd   :  { %v3264_v57 = vpop.permute.xlu1 %284  ;;  %v3266_v62 = vpop.permute.xlu0 %279 }
  0xce   :  { %4569 = vst [vmem:[#allocation53_spill] sm:$0xff] %v3264_v57  ;;  %4570 = vst [vmem:[#allocation54_spill] sm:$0xff] %v3266_v62 }
  0xcf   :  { %698 = vperm.xlu1 %2529, %v3002_v40   ;;  %702 = vperm.xlu0 %2528, %v2997_v39  }
  0xd1   :  { %v3270_v59 = vpop.permute.xlu1 %294  ;;  %v3272_v63 = vpop.permute.xlu0 %289 }
  0xd2   :  { %4571 = vst [vmem:[#allocation55_spill] sm:$0xff] %v3270_v59  ;;  %4572 = vst [vmem:[#allocation56_spill] sm:$0xff] %v3272_v63 }
  0xd3   :  { %706 = vperm.xlu1 %2529, %v3014_v42   ;;  %710 = vperm.xlu0 %2528, %v3009_v41  }
  0xd5   :  { %v3276_v61 = vpop.permute.xlu1 %304  ;;  %v3278_v60 = vpop.permute.xlu0 %299 }
  0xd6   :  { %4573 = vst [vmem:[#allocation57_spill] sm:$0xff] %v3276_v61  ;;  %4574 = vst [vmem:[#allocation58_spill] sm:$0xff] %v3278_v60 }
  0xd7   :  { %714 = vperm.xlu1 %2529, %v3026_v44   ;;  %718 = vperm.xlu0 %2528, %v3021_v43  }
  0xd9   :  { %v3282_v62 = vpop.permute.xlu1 %314  ;;  %v3284_v57 = vpop.permute.xlu0 %309 }
  0xda   :  { %4575 = vst [vmem:[#allocation59_spill] sm:$0xff] %v3282_v62  ;;  %4576 = vst [vmem:[#allocation60_spill] sm:$0xff] %v3284_v57 }
  0xdb   :  { %722 = vperm.xlu1 %2529, %v3038_v46   ;;  %726 = vperm.xlu0 %2528, %v3033_v45  }
  0xdd   :  { %v3288_v63 = vpop.permute.xlu1 %324  ;;  %v3290_v59 = vpop.permute.xlu0 %319 }
  0xde   :  { %4577 = vst [vmem:[#allocation61_spill] sm:$0xff] %v3288_v63  ;;  %4578 = vst [vmem:[#allocation62_spill] sm:$0xff] %v3290_v59 }
  0xdf   :  { %730 = vperm.xlu1 %2529, %v3050_v48   ;;  %734 = vperm.xlu0 %2528, %v3045_v47   ;;  %v4513_v48 = vmov 2  }
  0xe1   :  { %v3294_v60 = vpop.permute.xlu1 %334  ;;  %v3296_v61 = vpop.permute.xlu0 %329 }
  0xe2   :  { %4579 = vst [vmem:[#allocation63_spill] sm:$0xff] %v3294_v60  ;;  %4580 = vst [vmem:[#allocation64_spill] sm:$0xff] %v3296_v61 }
  0xe3   :  { %738 = vperm.xlu1 %2529, %v3062_v50   ;;  %742 = vperm.xlu0 %2528, %v3057_v49   ;;  %v4596_v50 = vld [vmem:[#allocation13_spill] sm:$0xff] }
  0xe5   :  { %v3300_v62 = vpop.permute.xlu1 %344  ;;  %v3302_v57 = vpop.permute.xlu0 %339 }
  0xe6   :  { %4581 = vst [vmem:[#allocation65_spill] sm:$0xff] %v3300_v62  ;;  %4582 = vst [vmem:[#allocation66_spill] sm:$0xff] %v3302_v57 }
  0xe7   :  { %746 = vperm.xlu1 %2529, %v3074_v52   ;;  %750 = vperm.xlu0 %2528, %v3069_v51   ;;  %v4592_v52 = vld [vmem:[#allocation11_spill] sm:$0xff] }
  0xe9   :  { %v3306_v63 = vpop.permute.xlu1 %354  ;;  %v3308_v59 = vpop.permute.xlu0 %349 }
  0xea   :  { %4583 = vst [vmem:[#allocation67_spill] sm:$0xff] %v3306_v63  ;;  %4584 = vst [vmem:[#allocation68_spill] sm:$0xff] %v3308_v59  ;;  %v4589_v63 = vld [vmem:[#allocation9_spill] sm:$0xff] }
  0xeb   :  { %754 = vperm.xlu1 %2529, %v3086_v54   ;;  %758 = vperm.xlu0 %2528, %v3081_v53  }
  0xed   :  { %v3312_v60 = vpop.permute.xlu1 %364  ;;  %v3314_v61 = vpop.permute.xlu0 %359 }
  0xee   :  { %4585 = vst [vmem:[#allocation69_spill] sm:$0xff] %v3312_v60  ;;  %4586 = vst [vmem:[#allocation70_spill] sm:$0xff] %v3314_v61  ;;  %v4593_v60 = vld [vmem:[#allocation10_spill] sm:$0xff] }
  0xef   :  { %762 = vperm.xlu1 %2529, %v3098_v56   ;;  %766 = vperm.xlu0 %2528, %v3093_v55  }
  0xf1   :  { %v3318_v62 = vpop.permute.xlu1 %374  ;;  %v3320_v57 = vpop.permute.xlu0 %369 }
  0xf2   :  { %4587 = vst [vmem:[#allocation71_spill] sm:$0xff] %v3318_v62  ;;  %4588 = vst [vmem:[#allocation72_spill] sm:$0xff] %v3320_v57  ;;  %v4597_v62 = vld [vmem:[#allocation12_spill] sm:$0xff] }
  0xf3   :  { %770 = vperm.xlu1 %2529, %v3110_v58   ;;  %774 = vperm.xlu0 %2528, %v4589_v63  }
  0xf5   :  { %v3324_v59 = vpop.permute.xlu1 %384  ;;  %v3326_v54 = vpop.permute.xlu0 %379 }
  0xf6   :  { %4590 = vst [vmem:[#allocation9_spill] sm:$0xff] %v3324_v59  ;;  %4591 = vst [vmem:[#allocation73_spill] sm:$0xff] %v3326_v54  ;;  %v4600_v59 = vld [vmem:[#allocation14_spill] sm:$0xff] }
  0xf7   :  { %778 = vperm.xlu1 %2529, %v4592_v52   ;;  %782 = vperm.xlu0 %2528, %v4593_v60  }
  0xf9   :  { %v3330_v61 = vpop.permute.xlu1 %394  ;;  %v3332_v56 = vpop.permute.xlu0 %389 }
  0xfa   :  { %4594 = vst [vmem:[#allocation11_spill] sm:$0xff] %v3330_v61  ;;  %4595 = vst [vmem:[#allocation10_spill] sm:$0xff] %v3332_v56 }
  0xfb   :  { %786 = vperm.xlu1 %2529, %v4596_v50   ;;  %790 = vperm.xlu0 %2528, %v4597_v62  }
  0xfd   :  { %v3336_v57 = vpop.permute.xlu1 %404  ;;  %v3338_v58 = vpop.permute.xlu0 %399 }
  0xfe   :  { %4598 = vst [vmem:[#allocation13_spill] sm:$0xff] %v3336_v57  ;;  %4599 = vst [vmem:[#allocation12_spill] sm:$0xff] %v3338_v58 }
  0xff   :  { %794 = vperm.xlu1 %2529, %v3146_v2   ;;  %798 = vperm.xlu0 %2528, %v4600_v59  }
 0x102   :  { %v3342_v54 = vpop.permute.xlu1 %550  ;;  %v3344_v52 = vpop.permute.xlu0 %546 }
 0x103   :  { %2530 = vset.pattern.permute.xlu1 %v4513_v48  ;;  %2531 = vset.pattern.permute.xlu0 %v4513_v48 }
 0x104   :  { %934 = vperm.xlu1 %2530, %v2774_v1   ;;  %938 = vperm.xlu0 %2531, %v2786_v4  }
 0x106   :  { %v3350_v50 = vpop.permute.xlu1 %554  ;;  %v3352_v57 = vpop.permute.xlu0 %558 }
 0x107   :  { %4601 = vst [vmem:[#allocation14_spill] sm:$0xff] %v3352_v57 }
 0x108   :  { %942 = vperm.xlu1 %2530, %v2769_v0   ;;  %950 = vperm.xlu0 %2531, %v2798_v6  }
 0x10a   :  { %v3356_v2 = vpop.permute.xlu1 %562  ;;  %v3358_v58 = vpop.permute.xlu0 %566 }
 0x10b   :  { %4602 = vst [vmem:[#allocation74_spill] sm:$0xff] %v3356_v2  ;;  %4603 = vst [vmem:[#allocation75_spill] sm:$0xff] %v3358_v58 }
 0x10c   :  { %946 = vperm.xlu1 %2530, %v2781_v3   ;;  %958 = vperm.xlu0 %2531, %v2810_v8  }
 0x10e   :  { %v3362_v48 = vpop.permute.xlu1 %570  ;;  %v3364_v61 = vpop.permute.xlu0 %574 }
 0x10f   :  { %4604 = vst [vmem:[#allocation76_spill] sm:$0xff] %v3362_v48  ;;  %4605 = vst [vmem:[#allocation77_spill] sm:$0xff] %v3364_v61 }
 0x110   :  { %954 = vperm.xlu1 %2530, %v2793_v5   ;;  %966 = vperm.xlu0 %2531, %v2822_v10  }
 0x112   :  { %v3368_v56 = vpop.permute.xlu1 %578  ;;  %v3370_v57 = vpop.permute.xlu0 %582 }
 0x113   :  { %4606 = vst [vmem:[#allocation78_spill] sm:$0xff] %v3368_v56  ;;  %4607 = vst [vmem:[#allocation79_spill] sm:$0xff] %v3370_v57 }
 0x114   :  { %962 = vperm.xlu1 %2530, %v2805_v7   ;;  %974 = vperm.xlu0 %2531, %v2834_v12  }
 0x116   :  { %v3374_v58 = vpop.permute.xlu1 %586  ;;  %v3376_v2 = vpop.permute.xlu0 %590 }
 0x117   :  { %4608 = vst [vmem:[#allocation80_spill] sm:$0xff] %v3374_v58  ;;  %4609 = vst [vmem:[#allocation81_spill] sm:$0xff] %v3376_v2 }
 0x118   :  { %970 = vperm.xlu1 %2530, %v2817_v9   ;;  %982 = vperm.xlu0 %2531, %v2846_v14  }
 0x11a   :  { %v3380_v61 = vpop.permute.xlu1 %594  ;;  %v3382_v48 = vpop.permute.xlu0 %598 }
 0x11b   :  { %4610 = vst [vmem:[#allocation82_spill] sm:$0xff] %v3380_v61  ;;  %4611 = vst [vmem:[#allocation83_spill] sm:$0xff] %v3382_v48 }
 0x11c   :  { %978 = vperm.xlu1 %2530, %v2829_v11   ;;  %990 = vperm.xlu0 %2531, %v2858_v16  }
 0x11e   :  { %v3386_v57 = vpop.permute.xlu1 %602  ;;  %v3388_v56 = vpop.permute.xlu0 %606 }
 0x11f   :  { %4612 = vst [vmem:[#allocation84_spill] sm:$0xff] %v3386_v57  ;;  %4613 = vst [vmem:[#allocation85_spill] sm:$0xff] %v3388_v56 }
 0x120   :  { %986 = vperm.xlu1 %2530, %v2841_v13   ;;  %998 = vperm.xlu0 %2531, %v2870_v18  }
 0x122   :  { %v3392_v2 = vpop.permute.xlu1 %610  ;;  %v3394_v58 = vpop.permute.xlu0 %614 }
 0x123   :  { %4614 = vst [vmem:[#allocation86_spill] sm:$0xff] %v3392_v2  ;;  %4615 = vst [vmem:[#allocation87_spill] sm:$0xff] %v3394_v58 }
 0x124   :  { %994 = vperm.xlu1 %2530, %v2853_v15   ;;  %1006 = vperm.xlu0 %2531, %v2882_v20  }
 0x126   :  { %v3398_v61 = vpop.permute.xlu1 %618  ;;  %v3400_v48 = vpop.permute.xlu0 %622 }
 0x127   :  { %4616 = vst [vmem:[#allocation88_spill] sm:$0xff] %v3398_v61  ;;  %4617 = vst [vmem:[#allocation89_spill] sm:$0xff] %v3400_v48 }
 0x128   :  { %1002 = vperm.xlu1 %2530, %v2865_v17   ;;  %1014 = vperm.xlu0 %2531, %v2894_v22  }
 0x12a   :  { %v3404_v57 = vpop.permute.xlu1 %626  ;;  %v3406_v56 = vpop.permute.xlu0 %630 }
 0x12b   :  { %4618 = vst [vmem:[#allocation90_spill] sm:$0xff] %v3404_v57  ;;  %4619 = vst [vmem:[#allocation91_spill] sm:$0xff] %v3406_v56  ;;  %v1778_v56 = vld [vmem:[%s4492_s3 + $0x28] sm:$0xff] }
 0x12c   :  { %1010 = vperm.xlu1 %2530, %v2877_v19   ;;  %1022 = vperm.xlu0 %2531, %v2906_v24  }
 0x12e   :  { %v3410_v2 = vpop.permute.xlu1 %634  ;;  %v3412_v58 = vpop.permute.xlu0 %638 }
 0x12f   :  { %4620 = vst [vmem:[#allocation92_spill] sm:$0xff] %v3410_v2  ;;  %4621 = vst [vmem:[#allocation93_spill] sm:$0xff] %v3412_v58 }
 0x130   :  { %1018 = vperm.xlu1 %2530, %v2889_v21   ;;  %1030 = vperm.xlu0 %2531, %v2918_v26  }
 0x132   :  { %v3416_v20 = vpop.permute.xlu1 %642  ;;  %v3418_v61 = vpop.permute.xlu0 %646 }
 0x133   :  { %4622 = vst [vmem:[#allocation94_spill] sm:$0xff] %v3416_v20  ;;  %4623 = vst [vmem:[#allocation95_spill] sm:$0xff] %v3418_v61 }
 0x134   :  { %1026 = vperm.xlu1 %2530, %v2901_v23   ;;  %1038 = vperm.xlu0 %2531, %v2930_v28  }
 0x136   :  { %v3422_v22 = vpop.permute.xlu1 %650  ;;  %v3424_v57 = vpop.permute.xlu0 %654 }
 0x137   :  { %4624 = vst [vmem:[#allocation96_spill] sm:$0xff] %v3422_v22  ;;  %4625 = vst [vmem:[#allocation97_spill] sm:$0xff] %v3424_v57  ;;  %v1776_v57 = vld [vmem:[%s4492_s3 + $0x18] sm:$0xff] }
 0x138   :  { %1034 = vperm.xlu1 %2530, %v2913_v25   ;;  %1046 = vperm.xlu0 %2531, %v2942_v30   ;;  %v1773_v30 = vld [vmem:[%s4492_s3] sm:$0xff] }
 0x13a   :  { %v3428_v24 = vpop.permute.xlu1 %658  ;;  %v3430_v2 = vpop.permute.xlu0 %662 }
 0x13b   :  { %4626 = vst [vmem:[#allocation98_spill] sm:$0xff] %v3428_v24  ;;  %4627 = vst [vmem:[#allocation99_spill] sm:$0xff] %v3430_v2  ;;  %v1775_v2 = vld [vmem:[%s4492_s3 + $0x10] sm:$0xff] }
 0x13c   :  { %1042 = vperm.xlu1 %2530, %v2925_v27   ;;  %1054 = vperm.xlu0 %2531, %v2954_v32   ;;  %v1774_v32 = vld [vmem:[%s4492_s3 + $0x8] sm:$0xff] }
 0x13d   :  { %v2471_v24 = vpack.c.bf16 %v1774_v32, %v1773_v30  ;;  %v2475_v30 = vpack.c.bf16 %v1776_v57, %v1775_v2  ;;  %v1777_v32 = vld [vmem:[%s4492_s3 + $0x20] sm:$0xff]  ;;  %v1779_v2 = vld [vmem:[%s4492_s3 + $0x30] sm:$0xff] }
 0x13e   :  { %v3434_v26 = vpop.permute.xlu1 %666  ;;  %v3436_v20 = vpop.permute.xlu0 %670  ;;  %v2479_v57 = vpack.c.bf16 %v1778_v56, %v1777_v32  ;;  %v1781_v32 = vld [vmem:[%s4492_s3 + $0x40] sm:$0xff] }
 0x13f   :  { %4628 = vst [vmem:[#allocation100_spill] sm:$0xff] %v3434_v26  ;;  %4629 = vst [vmem:[#allocation101_spill] sm:$0xff] %v3436_v20  ;;  %2472 = vmatprep.subr.bf16.mxu0 %v2471_v24  ;;  %2503 = vmatprep.subr.bf16.mxu1 %v2471_v24 }
 0x140   :  { %1050 = vperm.xlu1 %2530, %v2937_v29   ;;  %1062 = vperm.xlu0 %2531, %v2966_v34  }
 0x141   :  { %2474 = vmatpush3.bf16.msra.mxu0 %v2471_v24  ;;  %2511 = vmatpush3.bf16.msra.mxu1 %v2471_v24  ;;  %v1780_v24 = vld [vmem:[%s4492_s3 + $0x38] sm:$0xff] }
 0x142   :  { %v3440_v28 = vpop.permute.xlu1 %674  ;;  %v3442_v22 = vpop.permute.xlu0 %678  ;;  %2476 = vmatprep.subr.bf16.mxu0 %v2475_v30  ;;  %2504 = vmatprep.subr.bf16.mxu1 %v2475_v30  ;;  %v2483_v56 = vpack.c.bf16 %v1780_v24, %v1779_v2  ;;  %v1784_v24 = vld [vmem:[%s4492_s3 + $0x58] sm:$0xff] }
 0x144   :  { %1058 = vperm.xlu1 %2530, %v2949_v31   ;;  %1070 = vperm.xlu0 %2531, %v2978_v36  }
 0x145   :  { %2478 = vmatpush3.bf16.msra.mxu0 %v2475_v30  ;;  %2512 = vmatpush3.bf16.msra.mxu1 %v2475_v30  ;;  %v4515_v30 = vmov 3  }
 0x146   :  { %v3452_v26 = vpop.permute.xlu1 %682  ;;  %v3454_v20 = vpop.permute.xlu0 %686  ;;  %2480 = vmatprep.subr.bf16.mxu0 %v2479_v57  ;;  %2505 = vmatprep.subr.bf16.mxu1 %v2479_v57 }
 0x148   :  { %1066 = vperm.xlu1 %2530, %v2961_v33   ;;  %1078 = vperm.xlu0 %2531, %v2990_v38  }
 0x149   :  { %2482 = vmatpush3.bf16.msra.mxu0 %v2479_v57  ;;  %2513 = vmatpush3.bf16.msra.mxu1 %v2479_v57 }
 0x14a   :  { %v3464_v61 = vpop.permute.xlu1 %690  ;;  %v3466_v58 = vpop.permute.xlu0 %694  ;;  %2484 = vmatprep.subr.bf16.mxu0 %v2483_v56  ;;  %2506 = vmatprep.subr.bf16.mxu1 %v2483_v56 }
 0x14b   :  { %4630 = vst [vmem:[#allocation102_spill] sm:$0xff] %v3466_v58 }
 0x14c   :  { %1074 = vperm.xlu1 %2530, %v2973_v35   ;;  %1086 = vperm.xlu0 %2531, %v3002_v40  }
 0x14d   :  { %2486 = vmatpush3.bf16.msra.mxu0 %v2483_v56  ;;  %2514 = vmatpush3.bf16.msra.mxu1 %v2483_v56  ;;  %v1786_v56 = vld [vmem:[%s4492_s3 + $0x68] sm:$0xff] }
 0x14e   :  { %v3476_v48 = vpop.permute.xlu1 %698  ;;  %v3478_v58 = vpop.permute.xlu0 %702 }
 0x14f   :  { %4631 = vst [vmem:[#allocation103_spill] sm:$0xff] %v3476_v48  ;;  %4632 = vst [vmem:[#allocation104_spill] sm:$0xff] %v3478_v58 }
 0x150   :  { %1082 = vperm.xlu1 %2530, %v2985_v37   ;;  %1090 = vperm.xlu0 %2531, %v2997_v39  }
 0x152   :  { %v3488_v48 = vpop.permute.xlu1 %706  ;;  %v3490_v58 = vpop.permute.xlu0 %710 }
 0x153   :  { %4633 = vst [vmem:[#allocation105_spill] sm:$0xff] %v3488_v48  ;;  %4634 = vst [vmem:[#allocation106_spill] sm:$0xff] %v3490_v58  ;;  %v1782_v48 = vld [vmem:[%s4492_s3 + $0x48] sm:$0xff] }
 0x154   :  { %2532 = vset.pattern.permute.xlu1 %v4515_v30  ;;  %1098 = vperm.xlu0 %2531, %v3009_v41   ;;  %v2487_v57 = vpack.c.bf16 %v1782_v48, %v1781_v32 }
 0x155   :  { %1322 = vperm.xlu1 %2532, %v2774_v1   ;;  %v1783_v1 = vld [vmem:[%s4492_s3 + $0x50] sm:$0xff] }
 0x156   :  { %v3501_v58 = vpop.permute.xlu1 %714  ;;  %v3503_v2 = vpop.permute.xlu0 %718  ;;  %2488 = vmatprep.subr.bf16.mxu0 %v2487_v57  ;;  %2507 = vmatprep.subr.bf16.mxu1 %v2487_v57  ;;  %v2491_v48 = vpack.c.bf16 %v1784_v24, %v1783_v1  ;;  %v1788_v1 = vld [vmem:[%s4492_s3 + $0x78] sm:$0xff] }
 0x157   :  { %4635 = vst [vmem:[#allocation107_spill] sm:$0xff] %v3503_v2  ;;  %2490 = vmatpush3.bf16.msra.mxu0 %v2487_v57  ;;  %2515 = vmatpush3.bf16.msra.mxu1 %v2487_v57 }
 0x158   :  { %1106 = vperm.xlu0 %2531, %v3021_v43   ;;  %2492 = vmatprep.subr.bf16.mxu0 %v2491_v48 }
 0x159   :  { %1326 = vperm.xlu1 %2532, %v2786_v4   ;;  %v1785_v4 = vld [vmem:[%s4492_s3 + $0x60] sm:$0xff]  ;;  %2508 = vmatprep.subr.bf16.mxu1 %v2491_v48 }
 0x15a   :  { %v3513_v30 = vpop.permute.xlu1 %722  ;;  %v3515_v2 = vpop.permute.xlu0 %726  ;;  %v2495_v57 = vpack.c.bf16 %v1786_v56, %v1785_v4 }
 0x15b   :  { %4636 = vst [vmem:[#allocation108_spill] sm:$0xff] %v3513_v30  ;;  %4637 = vst [vmem:[#allocation109_spill] sm:$0xff] %v3515_v2  ;;  %2494 = vmatpush3.bf16.msra.mxu0 %v2491_v48  ;;  %2516 = vmatpush3.bf16.msra.mxu1 %v2491_v48  ;;  %v4715_v30 = vld [vmem:[#allocation50_spill] sm:$0xff] }
 0x15c   :  { %1114 = vperm.xlu0 %2531, %v3033_v45   ;;  %2496 = vmatprep.subr.bf16.mxu0 %v2495_v57 }
 0x15d   :  { %1454 = vperm.xlu1 %2532, %v2961_v33   ;;  %v1787_v33 = vld [vmem:[%s4492_s3 + $0x70] sm:$0xff]  ;;  %2509 = vmatprep.subr.bf16.mxu1 %v2495_v57 }
 0x15e   :  { %v3525_v32 = vpop.permute.xlu1 %730  ;;  %v3527_v2 = vpop.permute.xlu0 %734  ;;  %v2499_v48 = vpack.c.bf16 %v1788_v1, %v1787_v33 }
 0x15f   :  { %4638 = vst [vmem:[#allocation110_spill] sm:$0xff] %v3525_v32  ;;  %4639 = vst [vmem:[#allocation111_spill] sm:$0xff] %v3527_v2  ;;  %2498 = vmatpush3.bf16.msra.mxu0 %v2495_v57  ;;  %2517 = vmatpush3.bf16.msra.mxu1 %v2495_v57  ;;  %v4712_v32 = vld [vmem:[#allocation47_spill] sm:$0xff] }
 0x160   :  { %1122 = vperm.xlu0 %2531, %v3045_v47   ;;  %2500 = vmatprep.subr.bf16.mxu0 %v2499_v48 }
 0x161   :  { %1458 = vperm.xlu1 %2532, %v2978_v36   ;;  %2510 = vmatprep.subr.bf16.mxu1 %v2499_v48 }
 0x162   :  { %v3537_v24 = vpop.permute.xlu1 %738  ;;  %v3539_v2 = vpop.permute.xlu0 %742 }
 0x163   :  { %4640 = vst [vmem:[#allocation112_spill] sm:$0xff] %v3537_v24  ;;  %4641 = vst [vmem:[#allocation113_spill] sm:$0xff] %v3539_v2  ;;  %2502 = vmatpush3.bf16.msra.mxu0 %v2499_v48  ;;  %2518 = vmatpush3.bf16.msra.mxu1 %v2499_v48  ;;  %v4708_v2 = vld [vmem:[#allocation23_spill] sm:$0xff] }
 0x164   :  { %1130 = vperm.xlu0 %2531, %v3057_v49  }
 0x165   :  { %1462 = vperm.xlu1 %2532, %v2973_v35  }
 0x166   :  { %v3543_v36 = vpop.permute.xlu1 %746  ;;  %v3545_v4 = vpop.permute.xlu0 %750 }
 0x167   :  { %4642 = vst [vmem:[#allocation114_spill] sm:$0xff] %v3543_v36  ;;  %4643 = vst [vmem:[#allocation115_spill] sm:$0xff] %v3545_v4 }
 0x168   :  { %1138 = vperm.xlu0 %2531, %v3069_v51  }
 0x169   :  { %1466 = vperm.xlu1 %2532, %v2990_v38  }
 0x16a   :  { %v3549_v56 = vpop.permute.xlu1 %754  ;;  %v3551_v33 = vpop.permute.xlu0 %758 }
 0x16b   :  { %4644 = vst [vmem:[#allocation116_spill] sm:$0xff] %v3549_v56  ;;  %4645 = vst [vmem:[#allocation117_spill] sm:$0xff] %v3551_v33 }
 0x16c   :  { %1146 = vperm.xlu0 %2531, %v3081_v53  }
 0x16d   :  { %1470 = vperm.xlu1 %2532, %v2985_v37  }
 0x16e   :  { %v3555_v35 = vpop.permute.xlu1 %762  ;;  %v3557_v57 = vpop.permute.xlu0 %766 }
 0x16f   :  { %4646 = vst [vmem:[#allocation118_spill] sm:$0xff] %v3555_v35  ;;  %4647 = vst [vmem:[#allocation119_spill] sm:$0xff] %v3557_v57 }
 0x170   :  { %1154 = vperm.xlu0 %2531, %v3093_v55  }
 0x171   :  { %1346 = vperm.xlu1 %2532, %v2810_v8   ;;  %v4654_v8 = vmov 2  }
 0x172   :  { %v3561_v1 = vpop.permute.xlu1 %770  ;;  %v3563_v48 = vpop.permute.xlu0 %774 }
 0x173   :  { %4648 = vst [vmem:[#allocation120_spill] sm:$0xff] %v3561_v1  ;;  %4649 = vst [vmem:[#allocation121_spill] sm:$0xff] %v3563_v48  ;;  %v407_v1 = vlaneseq }
 0x174   :  { %1162 = vperm.xlu0 %2531, %v4589_v63   ;;  %v4657_v63 = vmov 3  }
 0x175   :  { %1474 = vperm.xlu1 %2532, %v3002_v40  }
 0x176   :  { %v3567_v38 = vpop.permute.xlu1 %778  ;;  %v3569_v53 = vpop.permute.xlu0 %782 }
 0x177   :  { %4650 = vst [vmem:[#allocation122_spill] sm:$0xff] %v3567_v38  ;;  %4651 = vst [vmem:[#allocation123_spill] sm:$0xff] %v3569_v53 }
 0x178   :  { %1170 = vperm.xlu0 %2531, %v4593_v60  }
 0x179   :  { %1478 = vperm.xlu1 %2532, %v2997_v39  }
 0x17a   :  { %v3573_v37 = vpop.permute.xlu1 %786  ;;  %v3575_v55 = vpop.permute.xlu0 %790 }
 0x17b   :  { %4652 = vst [vmem:[#allocation124_spill] sm:$0xff] %v3573_v37  ;;  %4653 = vst [vmem:[#allocation125_spill] sm:$0xff] %v3575_v55 }
 0x17c   :  { %1178 = vperm.xlu0 %2531, %v4597_v62  }
 0x17d   :  { %2533 = vset.pattern.permute.xlu1 %v4654_v8 }
 0x17e   :  { %v3579_v48 = vpop.permute.xlu1 %794  ;;  %1094 = vperm.xlu1 %2533, %v3014_v42   ;;  %v3582_v40 = vpop.permute.xlu0 %798 }
 0x17f   :  { %4655 = vst [vmem:[#allocation126_spill] sm:$0xff] %v3579_v48  ;;  %4656 = vst [vmem:[#allocation127_spill] sm:$0xff] %v3582_v40 }
 0x180   :  { %1186 = vperm.xlu0 %2531, %v4600_v59  }
 0x182   :  { %2534 = vset.pattern.permute.xlu1 %v4657_v63 }
 0x183   :  { %1354 = vperm.xlu1 %2534, %v2822_v10   ;;  %v3587_v39 = vpop.permute.xlu1 %934  ;;  %v3589_v60 = vpop.permute.xlu0 %938 }
 0x184   :  { %2556 = vset.pattern.permute.xlu0 %v4657_v63 }
 0x185   :  { %1450 = vperm.xlu0 %2556, %v2966_v34  }
 0x187   :  { %1482 = vperm.xlu1 %2534, %v3014_v42   ;;  %v3594_v62 = vpop.permute.xlu1 %942  ;;  %v3596_v48 = vpop.permute.xlu0 %950 }
 0x189   :  { %1330 = vperm.xlu0 %2556, %v2769_v0  }
 0x18b   :  { %1486 = vperm.xlu1 %2534, %v3009_v41   ;;  %v3600_v59 = vpop.permute.xlu1 %946  ;;  %v3602_v10 = vpop.permute.xlu0 %958 }
 0x18c   :  { %4658 = vst [vmem:[#allocation128_spill] sm:$0xff] %v3602_v10  ;;  %v4735_v10 = vld [vmem:[#allocation78_spill] sm:$0xff] }
 0x18d   :  { %1334 = vperm.xlu0 %2556, %v2781_v3  }
 0x18f   :  { %2535 = vset.pattern.permute.xlu1 %v4654_v8  ;;  %v3606_v40 = vpop.permute.xlu1 %954  ;;  %v3608_v34 = vpop.permute.xlu0 %966 }
 0x190   :  { %4659 = vst [vmem:[#allocation129_spill] sm:$0xff] %v3606_v40  ;;  %4660 = vst [vmem:[#allocation130_spill] sm:$0xff] %v3608_v34  ;;  %1102 = vperm.xlu1 %2535, %v3026_v44   ;;  %v4734_v40 = vld [vmem:[#allocation77_spill] sm:$0xff] }
 0x191   :  { %1338 = vperm.xlu0 %2556, %v2798_v6  }
 0x193   :  { %v3612_v42 = vpop.permute.xlu1 %962  ;;  %v3614_v0 = vpop.permute.xlu0 %974 }
 0x194   :  { %4661 = vst [vmem:[#allocation131_spill] sm:$0xff] %v3612_v42  ;;  %4662 = vst [vmem:[#allocation132_spill] sm:$0xff] %v3614_v0  ;;  %2536 = vset.pattern.permute.xlu1 %v4657_v63  ;;  %v4725_v0 = vld [vmem:[#allocation56_spill] sm:$0xff] }
 0x195   :  { %1362 = vperm.xlu1 %2536, %v2834_v12   ;;  %1342 = vperm.xlu0 %2556, %v2793_v5  }
 0x197   :  { %v3619_v3 = vpop.permute.xlu1 %970  ;;  %v3621_v41 = vpop.permute.xlu0 %982 }
 0x198   :  { %4663 = vst [vmem:[#allocation133_spill] sm:$0xff] %v3619_v3  ;;  %4664 = vst [vmem:[#allocation134_spill] sm:$0xff] %v3621_v41  ;;  %v4717_v41 = vld [vmem:[#allocation51_spill] sm:$0xff] }
 0x199   :  { %1490 = vperm.xlu1 %2536, %v3026_v44   ;;  %1350 = vperm.xlu0 %2556, %v2805_v7  }
 0x19b   :  { %v3625_v55 = vpop.permute.xlu1 %978  ;;  %v3627_v6 = vpop.permute.xlu0 %990 }
 0x19c   :  { %4665 = vst [vmem:[#allocation135_spill] sm:$0xff] %v3625_v55  ;;  %4666 = vst [vmem:[#allocation136_spill] sm:$0xff] %v3627_v6  ;;  %v4713_v6 = vld [vmem:[#allocation48_spill] sm:$0xff]  ;;  %v4721_v55 = vld [vmem:[#allocation53_spill] sm:$0xff] }
 0x19d   :  { %1494 = vperm.xlu1 %2536, %v3021_v43   ;;  %1358 = vperm.xlu0 %2556, %v2817_v9  }
 0x19f   :  { %v3631_v37 = vpop.permute.xlu1 %986  ;;  %v3633_v12 = vpop.permute.xlu0 %998 }
 0x1a0   :  { %4667 = vst [vmem:[#allocation137_spill] sm:$0xff] %v3631_v37  ;;  %4668 = vst [vmem:[#allocation138_spill] sm:$0xff] %v3633_v12  ;;  %v4710_v12 = vld [vmem:[#allocation24_spill] sm:$0xff]  ;;  %v4718_v37 = vld [vmem:[#allocation25_spill] sm:$0xff] }
 0x1a1   :  { %2537 = vset.pattern.permute.xlu1 %v4654_v8  ;;  %1366 = vperm.xlu0 %2556, %v2829_v11  }
 0x1a2   :  { %1110 = vperm.xlu1 %2537, %v3038_v46  }
 0x1a3   :  { %v3638_v5 = vpop.permute.xlu1 %994  ;;  %v3640_v7 = vpop.permute.xlu0 %1006 }
 0x1a4   :  { %4669 = vst [vmem:[#allocation139_spill] sm:$0xff] %v3638_v5  ;;  %4670 = vst [vmem:[#allocation140_spill] sm:$0xff] %v3640_v7 }
 0x1a5   :  { %1374 = vperm.xlu0 %2556, %v2841_v13  }
 0x1a6   :  { %2538 = vset.pattern.permute.xlu1 %v4657_v63 }
 0x1a7   :  { %1370 = vperm.xlu1 %2538, %v2846_v14   ;;  %v3645_v9 = vpop.permute.xlu1 %1002  ;;  %v3647_v43 = vpop.permute.xlu0 %1014 }
 0x1a8   :  { %4671 = vst [vmem:[#allocation141_spill] sm:$0xff] %v3645_v9  ;;  %4672 = vst [vmem:[#allocation142_spill] sm:$0xff] %v3647_v43 }
 0x1a9   :  { %1382 = vperm.xlu0 %2556, %v2853_v15  }
 0x1ab   :  { %1498 = vperm.xlu1 %2538, %v3038_v46   ;;  %v3651_v11 = vpop.permute.xlu1 %1010  ;;  %v3653_v44 = vpop.permute.xlu0 %1022  ;;  %v4679_v46 = vld [vmem:[#allocation5_spill] sm:$0xff] }
 0x1ac   :  { %4673 = vst [vmem:[#allocation143_spill] sm:$0xff] %v3651_v11  ;;  %4674 = vst [vmem:[#allocation144_spill] sm:$0xff] %v3653_v44  ;;  %v4706_v11 = vld [vmem:[#allocation21_spill] sm:$0xff] }
 0x1ad   :  { %1390 = vperm.xlu0 %2556, %v2865_v17  }
 0x1af   :  { %1502 = vperm.xlu1 %2538, %v3033_v45   ;;  %v3657_v13 = vpop.permute.xlu1 %1018  ;;  %v3659_v53 = vpop.permute.xlu0 %1030 }
 0x1b0   :  { %4675 = vst [vmem:[#allocation145_spill] sm:$0xff] %v3657_v13  ;;  %4676 = vst [vmem:[#allocation146_spill] sm:$0xff] %v3659_v53 }
 0x1b1   :  { %1398 = vperm.xlu0 %2556, %v2877_v19  }
 0x1b3   :  { %2539 = vset.pattern.permute.xlu1 %v4654_v8  ;;  %v3663_v14 = vpop.permute.xlu1 %1026  ;;  %v3665_v15 = vpop.permute.xlu0 %1038 }
 0x1b4   :  { %4677 = vst [vmem:[#allocation147_spill] sm:$0xff] %v3663_v14  ;;  %4678 = vst [vmem:[#allocation148_spill] sm:$0xff] %v3665_v15  ;;  %1118 = vperm.xlu1 %2539, %v4679_v46   ;;  %v4690_v14 = vld [vmem:[#allocation18_spill] sm:$0xff] }
 0x1b5   :  { %1406 = vperm.xlu0 %2556, %v2889_v21  }
 0x1b7   :  { %v3669_v38 = vpop.permute.xlu1 %1034  ;;  %v3671_v17 = vpop.permute.xlu0 %1046 }
 0x1b8   :  { %4680 = vst [vmem:[#allocation5_spill] sm:$0xff] %v3669_v38  ;;  %4681 = vst [vmem:[#allocation149_spill] sm:$0xff] %v3671_v17  ;;  %2540 = vset.pattern.permute.xlu1 %v4657_v63  ;;  %v408_v17 = vshrl.u32 %v407_v1, 7 }
 0x1b9   :  { %1378 = vperm.xlu1 %2540, %v2858_v16   ;;  %1414 = vperm.xlu0 %2556, %v2901_v23  }
 0x1bb   :  { %v3676_v19 = vpop.permute.xlu1 %1042  ;;  %v3678_v45 = vpop.permute.xlu0 %1054 }
 0x1bc   :  { %4682 = vst [vmem:[#allocation150_spill] sm:$0xff] %v3676_v19  ;;  %4683 = vst [vmem:[#allocation151_spill] sm:$0xff] %v3678_v45  ;;  %v409_v19 = vsub.s32 0, %v408_v17  ;;  %v803_v45 = vsub.s32 1, %v408_v17 }
 0x1bd   :  { %1506 = vperm.xlu1 %2540, %v4679_v46   ;;  %1422 = vperm.xlu0 %2556, %v2913_v25   ;;  %v85_v25 = vld [vmem:[%s4490_s1] sm:$0xf]  ;;  %v4686_v46 = vld [vmem:[#allocation6_spill] sm:$0xff] }
 0x1be   :  { %v3713_v57 = vrot.slane %v85_v25, %v803_v45 }
 0x1bf   :  { %v3682_v21 = vpop.permute.xlu1 %1050  ;;  %v3684_v15 = vpop.permute.xlu0 %1062 }
 0x1c0   :  { %4684 = vst [vmem:[#allocation152_spill] sm:$0xff] %v3682_v21  ;;  %v4688_v21 = vld [vmem:[#allocation16_spill] sm:$0xff] }
 0x1c1   :  { %1510 = vperm.xlu1 %2540, %v3045_v47   ;;  %1430 = vperm.xlu0 %2556, %v2925_v27   ;;  %v3702_v27 = vrot.slane %v85_v25, %v409_v19  ;;  %v1579_v19 = vsub.s32 3, %v408_v17 }
 0x1c3   :  { %v3688_v16 = vpop.permute.xlu1 %1058  ;;  %v3690_v23 = vpop.permute.xlu0 %1070  ;;  %4687 = vst [vmem:[#allocation6_spill] sm:$0xff] %v3702_v27  ;;  %v3734_v33 = vrot.slane %v85_v25, %v1579_v19  ;;  %v420_v24 = vmul.f32 %v3702_v27, %v4708_v2  ;;  %v419_v9 = vmul.f32 %v3702_v27, %v4710_v12  ;;  %v445_v12 = vmul.f32 %v3702_v27, %v4715_v30 }
 0x1c4   :  { %4685 = vst [vmem:[#allocation153_spill] sm:$0xff] %v3688_v16  ;;  %v1191_v16 = vsub.s32 2, %v408_v17  ;;  %v3829_v30 = vmul.f32 %v3702_v27, %v4718_v37 }
 0x1c5   :  { %2541 = vset.pattern.permute.xlu1 %v4654_v8  ;;  %1438 = vperm.xlu0 %2556, %v2937_v29   ;;  %v411_v29 = vmul.f32 %v3702_v27, %v4688_v21  ;;  %v412_v21 = vmul.f32 %v3702_v27, %v4690_v14 }
 0x1c6   :  { %1126 = vperm.xlu1 %2541, %v4686_v46   ;;  %v3715_v35 = vrot.slane %v85_v25, %v1191_v16 }
 0x1c7   :  { %v3698_v1 = vpop.permute.xlu1 %1066  ;;  %v3700_v47 = vpop.permute.xlu0 %1078 }
 0x1c8   :  { %v1193_v17 = vmul.f32 %v3715_v35, %v3587_v39  ;;  %v1194_v13 = vmul.f32 %v3715_v35, %v3589_v60 }
 0x1c9   :  { %1446 = vperm.xlu0 %2556, %v2949_v31   ;;  %v3720_v31 = vld [vmem:[%s4491_s2] ss:$0 sm:$0xff] }
 0x1ca   :  { %2542 = vset.pattern.permute.xlu1 %v4657_v63  ;;  %4689 = vst [vmem:[#allocation16_spill] sm:$0xff] %v3720_v31  ;;  %v481_v44 = vadd.f32 %v3720_v31, %v411_v29  ;;  %v482_v56 = vadd.f32 %v3720_v31, %v412_v21  ;;  %v806_v29 = vmul.f32 %v3713_v57, %v3342_v54  ;;  %v4694_v21 = vld [vmem:[#allocation7_spill] sm:$0xff] }
 0x1cb   :  { %1386 = vperm.xlu1 %2542, %v2870_v18   ;;  %v3709_v53 = vpop.permute.xlu1 %1074  ;;  %v3711_v38 = vpop.permute.xlu0 %1086  ;;  %v805_v18 = vmul.f32 %v3713_v57, %v3344_v52  ;;  %v515_v37 = vadd.f32 %v3720_v31, %v445_v12 }
 0x1cc   :  { %v870_v39 = vadd.f32 %v806_v29, %v482_v56  ;;  %v2686_v56 = vld [vmem:[%s4489_s0 + $0x90] sm:$0xff] }
 0x1cd   :  { %v869_v14 = vadd.f32 %v805_v18, %v481_v44 }
 0x1ce   :  { %v1258_v44 = vadd.f32 %v1194_v13, %v870_v39 }
 0x1cf   :  { %1514 = vperm.xlu1 %2542, %v4686_v46   ;;  %v3728_v45 = vpop.permute.xlu1 %1082  ;;  %v3730_v16 = vpop.permute.xlu0 %1090  ;;  %v1257_v43 = vadd.f32 %v1193_v17, %v869_v14 }
 0x1d0   :  { %4691 = vst [vmem:[#allocation18_spill] sm:$0xff] %v3730_v16  ;;  %v4736_v16 = vld [vmem:[#allocation79_spill] sm:$0xff] }
 0x1d3   :  { %1518 = vperm.xlu1 %2542, %v3057_v49   ;;  %v3740_v52 = vpop.permute.xlu0 %1098 }
 0x1d4   :  { %4692 = vst [vmem:[#allocation154_spill] sm:$0xff] %v3740_v52  ;;  %v1323_v46 = vpop.permute.xlu1 %1322  ;;  %v4732_v52 = vld [vmem:[#allocation75_spill] sm:$0xff] }
 0x1d5   :  { %v1581_v4 = vmul.f32 %v3734_v33, %v1323_v46 }
 0x1d7   :  { %2543 = vset.pattern.permute.xlu1 %v4654_v8  ;;  %v3746_v25 = vpop.permute.xlu0 %1106  ;;  %v1645_v19 = vadd.f32 %v1581_v4, %v1257_v43 }
 0x1d8   :  { %4693 = vst [vmem:[#allocation155_spill] sm:$0xff] %v3746_v25  ;;  %1134 = vperm.xlu1 %2543, %v4694_v21   ;;  %v1327_v54 = vpop.permute.xlu1 %1326  ;;  %v4723_v25 = vld [vmem:[#allocation54_spill] sm:$0xff] }
 0x1d9   :  { %v1582_v49 = vmul.f32 %v3734_v33, %v1327_v54  ;;  %2558 = vtanh.f32 %v1645_v19  ;;  %v4699_v54 = vld [vmem:[#allocation8_spill] sm:$0xff] }
 0x1db   :  { %v1646_v18 = vadd.f32 %v1582_v49, %v1258_v44  ;;  %v3750_v17 = vpop.permute.xlu0 %1114  ;;  %v4701_v49 = vld [vmem:[#allocation15_spill] sm:$0xff] }
 0x1dc   :  { %4695 = vst [vmem:[#allocation7_spill] sm:$0xff] %v3750_v17  ;;  %2544 = vset.pattern.permute.xlu1 %v4657_v63  ;;  %v3753_v60 = vpop.permute.xlu1 %1454  ;;  %v4714_v17 = vld [vmem:[#allocation49_spill] sm:$0xff] }
 0x1dd   :  { %2560 = vtanh.f32 %v1646_v18  ;;  %1394 = vperm.xlu1 %2544, %v2686_v56   ;;  %v413_v18 = vmul.f32 %v3702_v27, %v4701_v49  ;;  %v4702_v56 = vld [vmem:[#allocation17_spill] sm:$0xff]  ;;  %v418_v49 = vmul.f32 %v3702_v27, %v4706_v11  ;;  %v444_v11 = vmul.f32 %v3702_v27, %v4712_v32 }
 0x1df   :  { %v3758_v4 = vpop.permute.xlu0 %1122 }
 0x1e0   :  { %4696 = vst [vmem:[#allocation156_spill] sm:$0xff] %v3758_v4  ;;  %v3760_v43 = vpop.permute.xlu1 %1458  ;;  %v4711_v4 = vld [vmem:[#allocation26_spill] sm:$0xff] }
 0x1e1   :  { %1522 = vperm.xlu1 %2544, %v4694_v21  }
 0x1e3   :  { %v2559_v13 = vpop.eup %2558  ;;  %v3763_v29 = vpop.permute.xlu0 %1130 }
 0x1e4   :  { %4697 = vst [vmem:[#allocation157_spill] sm:$0xff] %v3763_v29  ;;  %v3765_v14 = vpop.permute.xlu1 %1462  ;;  %2375 = vmatprep.mubr.f32.mxu0 %v2559_v13  ;;  %v4703_v13 = vld [vmem:[#allocation19_spill] sm:$0xff]  ;;  %v4707_v29 = vld [vmem:[#allocation22_spill] sm:$0xff] }
 0x1e5   :  { %1526 = vperm.xlu1 %2544, %v3069_v51   ;;  %v414_v51 = vmul.f32 %v3702_v27, %v4702_v56  ;;  %v417_v56 = vmul.f32 %v3702_v27, %v4707_v29  ;;  %v443_v29 = vmul.f32 %v3702_v27, %v4713_v6  ;;  %v490_v6 = vadd.f32 %v3720_v31, %v420_v24 }
 0x1e6   :  { %v514_v24 = vadd.f32 %v3720_v31, %v444_v11 }
 0x1e7   :  { %v2561_v46 = vpop.eup %2560  ;;  %v3768_v39 = vpop.permute.xlu0 %1138  ;;  %v487_v32 = vadd.f32 %v3720_v31, %v417_v56 }
 0x1e8   :  { %4698 = vst [vmem:[#allocation158_spill] sm:$0xff] %v3768_v39  ;;  %v3770_v19 = vpop.permute.xlu1 %1466  ;;  %2376 = vmatmul.mubr.f32.vlgmr.msra.gmra.mrb[0].mxu0 %v2561_v46  ;;  %v416_v39 = vmul.f32 %v3702_v27, %v4703_v13  ;;  %v4704_v46 = vld [vmem:[#allocation20_spill] sm:$0xff] }
 0x1e9   :  { %2545 = vset.pattern.permute.xlu1 %v4654_v8  ;;  %v415_v36 = vmul.f32 %v3702_v27, %v4704_v46  ;;  %v483_v46 = vadd.f32 %v3720_v31, %v413_v18  ;;  %v446_v18 = vmul.f32 %v3702_v27, %v4714_v17  ;;  %v489_v17 = vadd.f32 %v3720_v31, %v419_v9 }
 0x1ea   :  { %1142 = vperm.xlu1 %2545, %v4699_v54   ;;  %v486_v2 = vadd.f32 %v3720_v31, %v416_v39  ;;  %v448_v39 = vmul.f32 %v3702_v27, %v4717_v41  ;;  %4719 = vst [vmem:[#allocation20_spill] sm:$0xff] %v3829_v30  ;;  %v513_v41 = vadd.f32 %v3720_v31, %v443_v29  ;;  %v4724_v30 = vld [vmem:[#allocation55_spill] sm:$0xff] }
 0x1eb   :  { %v3774_v44 = vpop.permute.xlu0 %1146  ;;  %v485_v5 = vadd.f32 %v3720_v31, %v415_v36  ;;  %v449_v9 = vmul.f32 %v3702_v27, %v4723_v25  ;;  %v516_v3 = vadd.f32 %v3720_v31, %v446_v18  ;;  %v4727_v25 = vld [vmem:[#allocation57_spill] sm:$0xff] }
 0x1ec   :  { %4700 = vst [vmem:[#allocation8_spill] sm:$0xff] %v3774_v44  ;;  %v3776_v21 = vpop.permute.xlu1 %1470  ;;  %v2687_v44 = vld [vmem:[%s4489_s0 + $0xa0] sm:$0xff]  ;;  %v518_v29 = vadd.f32 %v3720_v31, %v448_v39  ;;  %v454_v18 = vmul.f32 %v3702_v27, %v4727_v25  ;;  %v4731_v39 = vld [vmem:[#allocation74_spill] sm:$0xff] }
 0x1ed   :  { %v519_v25 = vadd.f32 %v3720_v31, %v449_v9 }
 0x1ee   :  { %2546 = vset.pattern.permute.xlu1 %v4657_v63 }
 0x1ef   :  { %1402 = vperm.xlu1 %2546, %v2687_v44   ;;  %v3790_v7 = vpop.permute.xlu0 %1154  ;;  %v484_v44 = vadd.f32 %v3720_v31, %v414_v51 }
 0x1f0   :  { %4705 = vst [vmem:[#allocation15_spill] sm:$0xff] %v3790_v7  ;;  %v3798_v13 = vpop.permute.xlu1 %1346  ;;  %v421_v7 = vmul.f32 %v3702_v27, %v4711_v4  ;;  %v488_v4 = vadd.f32 %v3720_v31, %v418_v49  ;;  %v450_v49 = vmul.f32 %v3702_v27, %v4721_v55  ;;  %v451_v55 = vmul.f32 %v3702_v27, %v4725_v0 }
 0x1f1   :  { %4709 = vst [vmem:[#allocation17_spill] sm:$0xff] %v3798_v13  ;;  %v809_v13 = vmul.f32 %v3713_v57, %v4731_v39  ;;  %v814_v39 = vmul.f32 %v3713_v57, %v4736_v16 }
 0x1f2   :  { %v3836_v56 = vadd.f32 %v3720_v31, %v421_v7  ;;  %v2688_v7 = vld [vmem:[%s4489_s0 + $0x1a8] sm:$0xff]  ;;  %v3864_v34 = vadd.f32 %v3720_v31, %v450_v49 }
 0x1f3   :  { %1530 = vperm.xlu1 %2546, %v4699_v54   ;;  %v3817_v51 = vpop.permute.xlu0 %1162  ;;  %v4720_v54 = vld [vmem:[#allocation52_spill] sm:$0xff] }
 0x1f4   :  { %4716 = vst [vmem:[#allocation19_spill] sm:$0xff] %v3817_v51  ;;  %v3824_v36 = vpop.permute.xlu1 %1474  ;;  %v447_v51 = vmul.f32 %v3702_v27, %v4720_v54  ;;  %4722 = vst [vmem:[#allocation21_spill] sm:$0xff] %v3836_v56  ;;  %v452_v54 = vmul.f32 %v3702_v27, %v4724_v30  ;;  %v4728_v56 = vld [vmem:[#allocation58_spill] sm:$0xff]  ;;  %v807_v30 = vmul.f32 %v3713_v57, %v3350_v50 }
 0x1f5   :  { %v453_v12 = vmul.f32 %v3702_v27, %v4728_v56  ;;  %v810_v56 = vmul.f32 %v3713_v57, %v4732_v52  ;;  %v4733_v27 = vld [vmem:[#allocation76_spill] sm:$0xff]  ;;  %v3887_v52 = vadd.f32 %v3720_v31, %v454_v18  ;;  %v838_v18 = vmul.f32 %v3713_v57, %v3442_v22 }
 0x1f6   :  { %v517_v0 = vadd.f32 %v3720_v31, %v447_v51  ;;  %v811_v50 = vmul.f32 %v3713_v57, %v4733_v27  ;;  %v812_v51 = vmul.f32 %v3713_v57, %v4734_v40  ;;  %v522_v49 = vadd.f32 %v3720_v31, %v452_v54 }
 0x1f7   :  { %1534 = vperm.xlu1 %2546, %v2688_v7   ;;  %v3851_v11 = vpop.permute.xlu0 %1170  ;;  %v4730_v7 = vld [vmem:[#allocation14_spill] sm:$0xff]  ;;  %v3890_v27 = vadd.f32 %v3720_v31, %v453_v12  ;;  %v871_v40 = vadd.f32 %v807_v30, %v483_v46  ;;  %v837_v54 = vmul.f32 %v3713_v57, %v3440_v28  ;;  %v839_v12 = vmul.f32 %v3713_v57, %v3452_v26 }
 0x1f8   :  { %4726 = vst [vmem:[#allocation22_spill] sm:$0xff] %v3851_v11  ;;  %v3860_v42 = vpop.permute.xlu1 %1478  ;;  %v808_v11 = vmul.f32 %v3713_v57, %v4730_v7  ;;  %v813_v7 = vmul.f32 %v3713_v57, %v4735_v10  ;;  %v2689_v10 = vld [vmem:[%s4489_s0 + $0x1b0] sm:$0xff]  ;;  %v3907_v46 = vadd.f32 %v810_v56, %v486_v2  ;;  %v3909_v28 = vadd.f32 %v811_v50, %v487_v32  ;;  %v4739_v2 = vld [vmem:[#allocation80_spill] sm:$0xff] }
 0x1f9   :  { %4729 = vst [vmem:[#allocation23_spill] sm:$0xff] %v3860_v42  ;;  %v521_v42 = vadd.f32 %v3720_v31, %v451_v55  ;;  %v3899_v55 = vadd.f32 %v809_v13, %v485_v5  ;;  %v3911_v30 = vadd.f32 %v812_v51, %v488_v4  ;;  %v3917_v5 = vadd.f32 %v814_v39, %v490_v6  ;;  %v4738_v13 = vld [vmem:[#allocation102_spill] sm:$0xff]  ;;  %v4740_v56 = vld [vmem:[#allocation103_spill] sm:$0xff]  ;;  %v4741_v39 = vld [vmem:[#allocation104_spill] sm:$0xff] }
 0x1fa   :  { %v3897_v16 = vadd.f32 %v808_v11, %v484_v44  ;;  %v840_v44 = vmul.f32 %v3713_v57, %v3454_v20  ;;  %v3915_v11 = vadd.f32 %v813_v7, %v489_v17  ;;  %v841_v22 = vmul.f32 %v3713_v57, %v3464_v61 }
 0x1fb   :  { %2547 = vset.pattern.permute.xlu1 %v4654_v8  ;;  %v3884_v9 = vpop.permute.xlu0 %1178  ;;  %v842_v26 = vmul.f32 %v3713_v57, %v4738_v13  ;;  %v3927_v32 = vmul.f32 %v3713_v57, %v4739_v2  ;;  %v901_v4 = vadd.f32 %v837_v54, %v513_v41  ;;  %v843_v20 = vmul.f32 %v3713_v57, %v4740_v56  ;;  %v2690_v41 = vld [vmem:[%s4489_s0 + $0xb0] sm:$0xff] }
 0x1fc   :  { %4737 = vst [vmem:[#allocation24_spill] sm:$0xff] %v3884_v9  ;;  %1150 = vperm.xlu1 %2547, %v2689_v10   ;;  %v1226_v6 = vmul.f32 %v3715_v35, %v3698_v1  ;;  %v902_v17 = vadd.f32 %v838_v18, %v514_v24  ;;  %v903_v61 = vadd.f32 %v839_v12, %v515_v37  ;;  %v4742_v1 = vld [vmem:[#allocation105_spill] sm:$0xff] }
 0x1fd   :  { %v3905_v9 = vpop.permute.xlu1 %1094  ;;  %v1225_v50 = vmul.f32 %v3715_v35, %v3684_v15  ;;  %v1227_v51 = vmul.f32 %v3715_v35, %v3690_v23  ;;  %v904_v7 = vadd.f32 %v840_v44, %v516_v3  ;;  %v844_v54 = vmul.f32 %v3713_v57, %v4741_v39  ;;  %v4743_v23 = vld [vmem:[#allocation106_spill] sm:$0xff] }
 0x1fe   :  { %v845_v13 = vmul.f32 %v3713_v57, %v4742_v1  ;;  %v1614_v24 = vmul.f32 %v3734_v33, %v3753_v60  ;;  %v905_v15 = vadd.f32 %v841_v22, %v517_v0  ;;  %v906_v18 = vadd.f32 %v842_v26, %v518_v29 }
 0x1ff   :  { %v3923_v31 = vpop.permute.xlu0 %1186  ;;  %v846_v12 = vmul.f32 %v3713_v57, %v4743_v23  ;;  %v1615_v2 = vmul.f32 %v3734_v33, %v3760_v43  ;;  %v907_v3 = vadd.f32 %v843_v20, %v519_v25  ;;  %v1195_v44 = vmul.f32 %v3715_v35, %v3594_v62 }
 0x200   :  { %2548 = vset.pattern.permute.xlu1 %v4657_v63  ;;  %v1290_v56 = vadd.f32 %v1226_v6, %v902_v17  ;;  %v1289_v60 = vadd.f32 %v1225_v50, %v901_v4  ;;  %v1291_v1 = vadd.f32 %v1227_v51, %v903_v61  ;;  %v1229_v29 = vmul.f32 %v3715_v35, %v3700_v47 }
 0x201   :  { %1410 = vperm.xlu1 %2548, %v2690_v41   ;;  %v1228_v41 = vmul.f32 %v3715_v35, %v3709_v53  ;;  %v908_v22 = vadd.f32 %v844_v54, %v3864_v34  ;;  %v909_v43 = vadd.f32 %v845_v13, %v521_v42  ;;  %v1616_v62 = vmul.f32 %v3734_v33, %v3765_v14 }
 0x202   :  { %v3947_v37 = vpop.permute.xlu1 %1354  ;;  %v1678_v25 = vadd.f32 %v1614_v24, %v1290_v56  ;;  %v3963_v20 = vadd.f32 %v846_v12, %v522_v49  ;;  %v1679_v53 = vadd.f32 %v1615_v2, %v1291_v1  ;;  %v1617_v4 = vmul.f32 %v3734_v33, %v3770_v19  ;;  %v2691_v19 = vld [vmem:[%s4489_s0 + $0x1b8] sm:$0xff]  ;;  %v4747_v1 = vld [vmem:[#allocation129_spill] sm:$0xff] }
 0x203   :  { %v1259_v17 = vadd.f32 %v1195_v44, %v871_v40  ;;  %v1196_v47 = vmul.f32 %v3715_v35, %v3600_v59  ;;  %v1230_v34 = vmul.f32 %v3715_v35, %v3728_v45  ;;  %v1293_v61 = vadd.f32 %v1229_v29, %v905_v15 }
 0x204   :  { %v1451_v39 = vpop.permute.xlu0 %1450  ;;  %v1231_v14 = vmul.f32 %v3715_v35, %v3711_v38  ;;  %v3979_v59 = vmul.f32 %v3713_v57, %v3501_v58  ;;  %v1618_v45 = vmul.f32 %v3734_v33, %v3776_v21  ;;  %v1619_v51 = vmul.f32 %v3734_v33, %v3824_v36  ;;  %v4744_v58 = vld [vmem:[#allocation18_spill] sm:$0xff]  ;;  %v4745_v36 = vld [vmem:[#allocation128_spill] sm:$0xff] }
 0x205   :  { %v1613_v0 = vmul.f32 %v3734_v33, %v1451_v39  ;;  %1538 = vperm.xlu1 %2548, %v2689_v10   ;;  %v1292_v10 = vadd.f32 %v1228_v41, %v904_v7  ;;  %v1681_v38 = vadd.f32 %v1617_v4, %v1293_v61  ;;  %v1197_v54 = vmul.f32 %v3715_v35, %v3596_v48  ;;  %v4749_v4 = vld [vmem:[#allocation17_spill] sm:$0xff] }
 0x206   :  { %v1483_v26 = vpop.permute.xlu1 %1482  ;;  %v1260_v13 = vadd.f32 %v1196_v47, %v3897_v16  ;;  %v1294_v24 = vadd.f32 %v1230_v34, %v906_v18  ;;  %v1232_v15 = vmul.f32 %v3715_v35, %v4744_v58  ;;  %v1295_v12 = vadd.f32 %v1231_v14, %v907_v3  ;;  %v4746_v16 = vld [vmem:[#allocation23_spill] sm:$0xff]  ;;  %v2692_v3 = vld [vmem:[%s4489_s0 + $0x1c0] sm:$0xff] }
 0x207   :  { %v1677_v6 = vadd.f32 %v1613_v0, %v1289_v60  ;;  %v1680_v40 = vadd.f32 %v1616_v62, %v1292_v10  ;;  %v1233_v21 = vmul.f32 %v3715_v35, %v3905_v9  ;;  %v1199_v44 = vmul.f32 %v3715_v35, %v4745_v36  ;;  %v4750_v10 = vld [vmem:[#allocation130_spill] sm:$0xff] }
 0x208   :  { %v1331_v42 = vpop.permute.xlu0 %1330  ;;  %v1682_v48 = vadd.f32 %v1618_v45, %v1294_v24  ;;  %v1620_v18 = vmul.f32 %v3734_v33, %v4746_v16  ;;  %v1683_v9 = vadd.f32 %v1619_v51, %v1295_v12  ;;  %v1621_v56 = vmul.f32 %v3734_v33, %v1483_v26  ;;  %v4752_v45 = vld [vmem:[#allocation131_spill] sm:$0xff]  ;;  %v4754_v16 = vld [vmem:[#allocation132_spill] sm:$0xff] }
 0x209   :  { %v1583_v49 = vmul.f32 %v3734_v33, %v1331_v42  ;;  %1542 = vperm.xlu1 %2548, %v2691_v19   ;;  %2562 = vtanh.f32 %v1677_v6  ;;  %v1261_v60 = vadd.f32 %v1197_v54, %v3899_v55  ;;  %v1198_v29 = vmul.f32 %v3715_v35, %v4747_v1 }
 0x20a   :  { %2564 = vtanh.f32 %v1678_v25  ;;  %v1487_v50 = vpop.permute.xlu1 %1486  ;;  %v1296_v0 = vadd.f32 %v1232_v15, %v908_v22  ;;  %v4748_v25 = vld [vmem:[#allocation154_spill] sm:$0xff]  ;;  %v1587_v6 = vmul.f32 %v3734_v33, %v4749_v4  ;;  %v1263_v26 = vadd.f32 %v1199_v44, %v3909_v28  ;;  %v4751_v28 = vld [vmem:[#allocation81_spill] sm:$0xff] }
 0x20b   :  { %2566 = vtanh.f32 %v1679_v53  ;;  %v1647_v7 = vadd.f32 %v1583_v49, %v1259_v17  ;;  %v1234_v62 = vmul.f32 %v3715_v35, %v4748_v25  ;;  %v1297_v17 = vadd.f32 %v1233_v21, %v909_v43  ;;  %v2693_v43 = vld [vmem:[%s4489_s0 + $0xc0] sm:$0xff] }
 0x20c   :  { %v1335_v23 = vpop.permute.xlu0 %1334  ;;  %v1201_v55 = vmul.f32 %v3715_v35, %v4750_v10  ;;  %v1684_v34 = vadd.f32 %v1620_v18, %v1296_v0  ;;  %v1622_v61 = vmul.f32 %v3734_v33, %v1487_v50  ;;  %v4020_v19 = vmul.f32 %v3713_v57, %v4751_v28  ;;  %v4761_v28 = vld [vmem:[#allocation27_spill] sm:$0xff] }
 0x20d   :  { %2568 = vtanh.f32 %v1647_v7  ;;  %v1584_v2 = vmul.f32 %v3734_v33, %v1335_v23  ;;  %2549 = vset.pattern.permute.xlu1 %v4654_v8  ;;  %v1685_v42 = vadd.f32 %v1621_v56, %v1297_v17  ;;  %v1298_v51 = vadd.f32 %v1234_v62, %v3963_v20 }
 0x20e   :  { %2570 = vtanh.f32 %v1680_v40  ;;  %1158 = vperm.xlu1 %2549, %v2692_v3   ;;  %v1262_v40 = vadd.f32 %v1198_v29, %v3907_v46  ;;  %v911_v15 = vadd.f32 %v3979_v59, %v3890_v27  ;;  %v4753_v46 = vld [vmem:[#allocation107_spill] sm:$0xff]  ;;  %v1589_v20 = vmul.f32 %v3734_v33, %v3947_v37  ;;  %v4755_v59 = vld [vmem:[#allocation133_spill] sm:$0xff] }
 0x20f   :  { %2572 = vtanh.f32 %v1681_v38  ;;  %v1648_v41 = vadd.f32 %v1584_v2, %v1260_v13  ;;  %v1103_v39 = vpop.permute.xlu1 %1102  ;;  %v1200_v38 = vmul.f32 %v3715_v35, %v4752_v45  ;;  %v1651_v13 = vadd.f32 %v1587_v6, %v1263_v26  ;;  %v2694_v6 = vld [vmem:[%s4489_s0 + $0x1c8] sm:$0xff]  ;;  %v4759_v26 = vld [vmem:[#allocation16_spill] sm:$0xff] }
 0x210   :  { %v1339_v53 = vpop.permute.xlu0 %1338  ;;  %v1235_v24 = vmul.f32 %v3715_v35, %v1103_v39  ;;  %v848_v23 = vmul.f32 %v3713_v57, %v4753_v46  ;;  %v1265_v21 = vadd.f32 %v1201_v55, %v3915_v11  ;;  %v1686_v2 = vadd.f32 %v1622_v61, %v1298_v51  ;;  %v4760_v55 = vld [vmem:[#allocation135_spill] sm:$0xff] }
 0x211   :  { %2574 = vtanh.f32 %v1648_v41  ;;  %v1585_v47 = vmul.f32 %v3734_v33, %v1339_v53  ;;  %v1203_v27 = vmul.f32 %v3715_v35, %v4754_v16  ;;  %v1202_v18 = vmul.f32 %v3715_v35, %v4755_v59  ;;  %v2695_v46 = vld [vmem:[%s4489_s0 + $0x1d0] sm:$0xff]  ;;  %v4766_v16 = vld [vmem:[#allocation137_spill] sm:$0xff] }
 0x212   :  { %2576 = vtanh.f32 %v1682_v48  ;;  %2550 = vset.pattern.permute.xlu1 %v4657_v63  ;;  %v1264_v48 = vadd.f32 %v1200_v38, %v3911_v30  ;;  %v1299_v39 = vadd.f32 %v1235_v24, %v911_v15  ;;  %v4757_v30 = vld [vmem:[#allocation21_spill] sm:$0xff]  ;;  %v912_v29 = vadd.f32 %v848_v23, %v3887_v52  ;;  %v4763_v38 = vld [vmem:[#allocation28_spill] sm:$0xff] }
 0x213   :  { %v2563_v22 = vpop.eup %2562  ;;  %2578 = vtanh.f32 %v1683_v9  ;;  %v1649_v14 = vadd.f32 %v1585_v47, %v1261_v60  ;;  %1418 = vperm.xlu1 %2550, %v2693_v43   ;;  %v4756_v9 = vld [vmem:[#allocation155_spill] sm:$0xff]  ;;  %v879_v1 = vadd.f32 %v3927_v32, %v4757_v30  ;;  %v1653_v0 = vadd.f32 %v1589_v20, %v1265_v21  ;;  %v4758_v47 = vld [vmem:[#allocation20_spill] sm:$0xff]  ;;  %v4765_v20 = vld [vmem:[#allocation82_spill] sm:$0xff] }
 0x214   :  { %v2565_v49 = vpop.eup %2564  ;;  %v1363_v7 = vpop.permute.xlu1 %1362  ;;  %2423 = vmatprep.mubr.f32.mxu1 %v2563_v22  ;;  %v1236_v37 = vmul.f32 %v3715_v35, %v4756_v9  ;;  %v492_v32 = vadd.f32 %v4759_v26, %v4758_v47  ;;  %v1266_v52 = vadd.f32 %v1202_v18, %v3917_v5  ;;  %v4767_v18 = vld [vmem:[#allocation60_spill] sm:$0xff] }
 0x215   :  { %v1343_v50 = vpop.permute.xlu0 %1342  ;;  %v2567_v54 = vpop.eup %2566  ;;  %2580 = vtanh.f32 %v1649_v14  ;;  %2424 = vmatmul.mubr.f32.vlgmr.msra.gmra.mrb[0].mxu1 %v2565_v49  ;;  %v1591_v62 = vmul.f32 %v3734_v33, %v1363_v7  ;;  %v1267_v10 = vadd.f32 %v1203_v27, %v879_v1  ;;  %v1206_v27 = vmul.f32 %v3715_v35, %v4766_v16  ;;  %v4769_v1 = vld [vmem:[#allocation108_spill] sm:$0xff]  ;;  %v2698_v16 = vld [vmem:[%s4489_s0 + $0x1e0] sm:$0xff] }
 0x216   :  { %v1586_v58 = vmul.f32 %v3734_v33, %v1343_v50  ;;  %2582 = vtanh.f32 %v1684_v34  ;;  %2426 = vmatprep.mubr.f32.mxu1 %v2567_v54  ;;  %v1204_v34 = vmul.f32 %v3715_v35, %v4760_v55  ;;  %v1300_v14 = vadd.f32 %v1236_v37, %v912_v29  ;;  %v4768_v37 = vld [vmem:[#allocation134_spill] sm:$0xff] }
 0x217   :  { %v2569_v12 = vpop.eup %2568  ;;  %2584 = vtanh.f32 %v1685_v42  ;;  %1546 = vperm.xlu1 %2550, %v2692_v3   ;;  %v880_v51 = vadd.f32 %v4020_v19, %v492_v32  ;;  %v1655_v50 = vadd.f32 %v1591_v62, %v1267_v10  ;;  %v849_v29 = vmul.f32 %v3713_v57, %v4769_v1  ;;  %v4770_v62 = vld [vmem:[#allocation59_spill] sm:$0xff] }
 0x218   :  { %v1650_v36 = vadd.f32 %v1586_v58, %v1262_v40  ;;  %v2571_v44 = vpop.eup %2570  ;;  %v1491_v56 = vpop.permute.xlu1 %1490  ;;  %2378 = vmatprep.mubr.f32.mxu0 %v2569_v12  ;;  %2586 = vtanh.f32 %v1651_v13  ;;  %v4762_v40 = vld [vmem:[#allocation6_spill] sm:$0xff]  ;;  %v4764_v58 = vld [vmem:[#allocation83_spill] sm:$0xff]  ;;  %v817_v12 = vmul.f32 %v3713_v57, %v4765_v20  ;;  %v4773_v20 = vld [vmem:[#allocation29_spill] sm:$0xff] }
 0x219   :  { %v1351_v41 = vpop.permute.xlu0 %1350  ;;  %v2573_v11 = vpop.eup %2572  ;;  %v1623_v3 = vmul.f32 %v3734_v33, %v1491_v56  ;;  %2427 = vmatmul.mubr.f32.gmra.mrb[2].mxu1 %v2571_v44  ;;  %v424_v45 = vmul.f32 %v4762_v40, %v4761_v28  ;;  %v423_v5 = vmul.f32 %v4762_v40, %v4763_v38  ;;  %v818_v15 = vmul.f32 %v3713_v57, %v4764_v58  ;;  %v4772_v38 = vld [vmem:[#allocation7_spill] sm:$0xff]  ;;  %v2697_v58 = vld [vmem:[%s4489_s0 + $0x1d8] sm:$0xff] }
 0x21a   :  { %v1588_v60 = vmul.f32 %v3734_v33, %v1351_v41  ;;  %2588 = vtanh.f32 %v1650_v36  ;;  %2429 = vmatprep.mubr.f32.mxu1 %v2573_v11  ;;  %v1268_v21 = vadd.f32 %v1204_v34, %v880_v51  ;;  %v455_v9 = vmul.f32 %v4762_v40, %v4767_v18 }
 0x21b   :  { %v2575_v25 = vpop.eup %2574  ;;  %2590 = vtanh.f32 %v1686_v2  ;;  %v1687_v53 = vadd.f32 %v1623_v3, %v1299_v39  ;;  %1550 = vperm.xlu1 %2550, %v2694_v6   ;;  %v494_v44 = vadd.f32 %v4759_v26, %v424_v45  ;;  %v1205_v56 = vmul.f32 %v3715_v35, %v4768_v37 }
 0x21c   :  { %v1652_v4 = vadd.f32 %v1588_v60, %v1264_v48  ;;  %v2577_v17 = vpop.eup %2576  ;;  %v1495_v22 = vpop.permute.xlu1 %1494  ;;  %2379 = vmatmul.mubr.f32.gmra.mrb[2].mxu0 %v2575_v25  ;;  %v493_v48 = vadd.f32 %v4759_v26, %v423_v5  ;;  %v2696_v25 = vld [vmem:[%s4489_s0 + $0xd0] sm:$0xff]  ;;  %v525_v47 = vadd.f32 %v4759_v26, %v455_v9  ;;  %v1238_v5 = vmul.f32 %v3715_v35, %v4772_v38 }
 0x21d   :  { %v1359_v42 = vpop.permute.xlu0 %1358  ;;  %v2579_v61 = vpop.eup %2578  ;;  %2592 = vtanh.f32 %v1687_v53  ;;  %v1624_v43 = vmul.f32 %v3734_v33, %v1495_v22  ;;  %2430 = vmatmul.mubr.f32.gmra.mrb[4].mxu1 %v2577_v17  ;;  %v882_v39 = vadd.f32 %v818_v15, %v494_v44  ;;  %v456_v53 = vmul.f32 %v4762_v40, %v4770_v62  ;;  %v4775_v44 = vld [vmem:[#allocation85_spill] sm:$0xff] }
 0x21e   :  { %v1590_v49 = vmul.f32 %v3734_v33, %v1359_v42  ;;  %2594 = vtanh.f32 %v1652_v4  ;;  %2432 = vmatprep.mubr.f32.mxu1 %v2579_v61  ;;  %v881_v30 = vadd.f32 %v817_v12, %v493_v48  ;;  %v913_v42 = vadd.f32 %v849_v29, %v525_v47  ;;  %v4771_v61 = vld [vmem:[#allocation109_spill] sm:$0xff] }
 0x21f   :  { %v2581_v7 = vpop.eup %2580  ;;  %2596 = vtanh.f32 %v1653_v0  ;;  %v1688_v54 = vadd.f32 %v1624_v43, %v1300_v14  ;;  %2551 = vset.pattern.permute.xlu1 %v4654_v8  ;;  %v1270_v4 = vadd.f32 %v1206_v27, %v882_v39  ;;  %v850_v14 = vmul.f32 %v3713_v57, %v4771_v61  ;;  %v4776_v27 = vld [vmem:[#allocation84_spill] sm:$0xff] }
 0x220   :  { %v1654_v13 = vadd.f32 %v1590_v49, %v1266_v52  ;;  %v2583_v24 = vpop.eup %2582  ;;  %1166 = vperm.xlu1 %2551, %v2695_v46   ;;  %2381 = vmatprep.mubr.f32.mxu0 %v2581_v7  ;;  %v1269_v32 = vadd.f32 %v1205_v56, %v881_v30  ;;  %v526_v49 = vadd.f32 %v4759_v26, %v456_v53  ;;  %v4777_v56 = vld [vmem:[#allocation139_spill] sm:$0xff]  ;;  %v4779_v30 = vld [vmem:[#allocation136_spill] sm:$0xff]  ;;  %v4780_v53 = vld [vmem:[#allocation110_spill] sm:$0xff] }
 0x221   :  { %v1367_v19 = vpop.permute.xlu0 %1366  ;;  %v2585_v23 = vpop.eup %2584  ;;  %2598 = vtanh.f32 %v1688_v54  ;;  %2433 = vmatmul.mubr.f32.gmra.mrb[6].mxu1 %v2583_v24  ;;  %v426_v12 = vmul.f32 %v4762_v40, %v4773_v20  ;;  %v820_v48 = vmul.f32 %v3713_v57, %v4775_v44  ;;  %v1207_v1 = vmul.f32 %v3715_v35, %v4779_v30 }
 0x222   :  { %v1592_v2 = vmul.f32 %v3734_v33, %v1367_v19  ;;  %v1111_v36 = vpop.permute.xlu1 %1110  ;;  %2600 = vtanh.f32 %v1654_v13  ;;  %2435 = vmatprep.mubr.f32.mxu1 %v2585_v23  ;;  %v2587_v59 = vpop.eup %2586  ;;  %v914_v13 = vadd.f32 %v850_v14, %v526_v49 }
 0x223   :  { %2602 = vtanh.f32 %v1655_v50  ;;  %v1237_v10 = vmul.f32 %v3715_v35, %v1111_v36  ;;  %v496_v37 = vadd.f32 %v4759_v26, %v426_v12  ;;  %v4785_v12 = vld [vmem:[#allocation32_spill] sm:$0xff] }
 0x224   :  { %v1656_v41 = vadd.f32 %v1592_v2, %v1268_v21  ;;  %v2589_v11 = vpop.eup %2588  ;;  %2552 = vset.pattern.permute.xlu1 %v4657_v63  ;;  %v1302_v19 = vadd.f32 %v1238_v5, %v914_v13  ;;  %v4774_v21 = vld [vmem:[#allocation30_spill] sm:$0xff] }
 0x225   :  { %v1375_v3 = vpop.permute.xlu0 %1374  ;;  %v2591_v60 = vpop.eup %2590  ;;  %2382 = vmatmul.mubr.f32.gmra.mrb[4].mxu0 %v2589_v11  ;;  %1426 = vperm.xlu1 %2552, %v2696_v25   ;;  %v1301_v51 = vadd.f32 %v1237_v10, %v913_v42  ;;  %v425_v2 = vmul.f32 %v4762_v40, %v4774_v21  ;;  %v427_v21 = vmul.f32 %v4762_v40, %v4785_v12  ;;  %v4797_v12 = vld [vmem:[#allocation89_spill] sm:$0xff] }
 0x226   :  { %2604 = vtanh.f32 %v1656_v41  ;;  %v1594_v0 = vmul.f32 %v3734_v33, %v1375_v3  ;;  %2384 = vmatprep.mubr.f32.mxu0 %v2587_v59  ;;  %2436 = vmatmul.mubr.f32.gmra.mrb[8].mxu1 %v2591_v60  ;;  %v1371_v6 = vpop.permute.xlu1 %1370  ;;  %v819_v59 = vmul.f32 %v3713_v57, %v4776_v27  ;;  %v1208_v41 = vmul.f32 %v3715_v35, %v4777_v56  ;;  %v4778_v3 = vld [vmem:[#allocation62_spill] sm:$0xff] }
 0x227   :  { %v2593_v17 = vpop.eup %2592  ;;  %v1593_v52 = vmul.f32 %v3734_v33, %v1371_v6  ;;  %v495_v39 = vadd.f32 %v4759_v26, %v425_v2  ;;  %v457_v60 = vmul.f32 %v4762_v40, %v4778_v3  ;;  %v2699_v6 = vld [vmem:[%s4489_s0 + $0xe0] sm:$0xff]  ;;  %v4790_v3 = vld [vmem:[#allocation138_spill] sm:$0xff] }
 0x228   :  { %v2595_v55 = vpop.eup %2594  ;;  %v1658_v34 = vadd.f32 %v1594_v0, %v1270_v4  ;;  %2438 = vmatprep.mubr.f32.mxu1 %v2593_v17  ;;  %v884_v0 = vadd.f32 %v820_v48, %v496_v37  ;;  %v851_v4 = vmul.f32 %v3713_v57, %v4780_v53  ;;  %v4781_v17 = vld [vmem:[#allocation61_spill] sm:$0xff]  ;;  %v2701_v48 = vld [vmem:[%s4489_s0 + $0x1f0] sm:$0xff] }
 0x229   :  { %v2597_v22 = vpop.eup %2596  ;;  %v1657_v43 = vadd.f32 %v1593_v52, %v1269_v32  ;;  %2385 = vmatmul.mubr.f32.gmra.mrb[6].mxu0 %v2595_v55  ;;  %1554 = vperm.xlu1 %2552, %v2695_v46   ;;  %v1383_v18 = vpop.permute.xlu0 %1382  ;;  %v883_v62 = vadd.f32 %v819_v59, %v495_v39  ;;  %v458_v47 = vmul.f32 %v4762_v40, %v4781_v17  ;;  %v4788_v37 = vld [vmem:[#allocation141_spill] sm:$0xff]  ;;  %v2702_v53 = vld [vmem:[%s4489_s0 + $0xf0] sm:$0xff] }
 0x22a   :  { %2387 = vmatprep.mubr.f32.mxu0 %v2597_v22  ;;  %v1499_v28 = vpop.permute.xlu1 %1498  ;;  %v1596_v25 = vmul.f32 %v3734_v33, %v1383_v18  ;;  %v1272_v32 = vadd.f32 %v1208_v41, %v884_v0  ;;  %v527_v55 = vadd.f32 %v4759_v26, %v457_v60  ;;  %v1210_v56 = vmul.f32 %v3715_v35, %v4788_v37  ;;  %v4800_v37 = vld [vmem:[#allocation66_spill] sm:$0xff] }
 0x22b   :  { %v2599_v45 = vpop.eup %2598  ;;  %2606 = vtanh.f32 %v1657_v43  ;;  %v1625_v7 = vmul.f32 %v3734_v33, %v1499_v28  ;;  %v4782_v43 = vld [vmem:[#allocation111_spill] sm:$0xff]  ;;  %v497_v41 = vadd.f32 %v4759_v26, %v427_v21  ;;  %v1209_v60 = vmul.f32 %v3715_v35, %v4790_v3 }
 0x22c   :  { %v2601_v50 = vpop.eup %2600  ;;  %2608 = vtanh.f32 %v1658_v34  ;;  %2439 = vmatmul.mubr.f32.gmra.mrb[10].mxu1 %v2599_v45  ;;  %v1271_v34 = vadd.f32 %v1207_v1, %v883_v62  ;;  %v1660_v61 = vadd.f32 %v1596_v25, %v1272_v32  ;;  %v915_v14 = vadd.f32 %v851_v4, %v527_v55  ;;  %v4791_v25 = vld [vmem:[#allocation112_spill] sm:$0xff]  ;;  %v4792_v4 = vld [vmem:[#allocation63_spill] sm:$0xff] }
 0x22d   :  { %v2603_v54 = vpop.eup %2602  ;;  %v1689_v24 = vadd.f32 %v1625_v7, %v1301_v51  ;;  %2388 = vmatmul.mubr.f32.gmra.mrb[8].mxu0 %v2601_v50  ;;  %1558 = vperm.xlu1 %2552, %v2697_v58   ;;  %v852_v49 = vmul.f32 %v3713_v57, %v4782_v43  ;;  %v528_v45 = vadd.f32 %v4759_v26, %v458_v47  ;;  %v4783_v51 = vld [vmem:[#allocation156_spill] sm:$0xff]  ;;  %v2700_v58 = vld [vmem:[%s4489_s0 + $0x1e8] sm:$0xff]  ;;  %v1391_v59 = vpop.permute.xlu0 %1390 }
 0x22e   :  { %2390 = vmatprep.mubr.f32.mxu0 %v2603_v54  ;;  %v1503_v15 = vpop.permute.xlu1 %1502  ;;  %v1240_v7 = vmul.f32 %v3715_v35, %v4783_v51  ;;  %v853_v62 = vmul.f32 %v3713_v57, %v4791_v25  ;;  %v824_v21 = vmul.f32 %v3713_v57, %v4797_v12 }
 0x22f   :  { %2610 = vtanh.f32 %v1689_v24  ;;  %v1626_v23 = vmul.f32 %v3734_v33, %v1503_v15  ;;  %v916_v13 = vadd.f32 %v852_v49, %v528_v45  ;;  %v4794_v45 = vld [vmem:[#allocation157_spill] sm:$0xff] }
 0x230   :  { %v2605_v46 = vpop.eup %2604 }
 0x231   :  { %v1690_v36 = vadd.f32 %v1626_v23, %v1302_v19  ;;  %2391 = vmatmul.mubr.f32.gmra.mrb[10].mxu0 %v2605_v46  ;;  %2553 = vset.pattern.permute.xlu1 %v4654_v8  ;;  %v1304_v46 = vadd.f32 %v1240_v7, %v916_v13  ;;  %v4784_v23 = vld [vmem:[#allocation31_spill] sm:$0xff] }
 0x232   :  { %1174 = vperm.xlu1 %2553, %v2698_v16   ;;  %v428_v20 = vmul.f32 %v4762_v40, %v4784_v23 }
 0x233   :  { %2612 = vtanh.f32 %v1690_v36  ;;  %v1119_v9 = vpop.permute.xlu1 %1118  ;;  %v4786_v36 = vld [vmem:[#allocation87_spill] sm:$0xff] }
 0x234   :  { %v1239_v22 = vmul.f32 %v3715_v35, %v1119_v9  ;;  %v822_v44 = vmul.f32 %v3713_v57, %v4786_v36  ;;  %v498_v9 = vadd.f32 %v4759_v26, %v428_v20 }
 0x235   :  { %v2607_v11 = vpop.eup %2606 }
 0x236   :  { %v2609_v29 = vpop.eup %2608  ;;  %2554 = vset.pattern.permute.xlu1 %v4657_v63  ;;  %2393 = vmatprep.mubr.f32.mxu0 %v2607_v11  ;;  %v1303_v50 = vadd.f32 %v1239_v22, %v915_v14  ;;  %v4789_v11 = vld [vmem:[#allocation64_spill] sm:$0xff]  ;;  %v886_v1 = vadd.f32 %v822_v44, %v498_v9  ;;  %v1399_v44 = vpop.permute.xlu0 %1398 }
 0x237   :  { %1434 = vperm.xlu1 %2554, %v2699_v6   ;;  %2394 = vmatmul.mubr.f32.gmra.mrb[12].mxu0 %v2609_v29  ;;  %v459_v39 = vmul.f32 %v4762_v40, %v4789_v11  ;;  %v1598_v29 = vmul.f32 %v3734_v33, %v1391_v59  ;;  %v460_v6 = vmul.f32 %v4762_v40, %v4792_v4 }
 0x238   :  { %v1379_v10 = vpop.permute.xlu1 %1378  ;;  %v1274_v17 = vadd.f32 %v1210_v56, %v886_v1  ;;  %v461_v56 = vmul.f32 %v4762_v40, %v4800_v37  ;;  %v1600_v3 = vmul.f32 %v3734_v33, %v1399_v44 }
 0x239   :  { %v2611_v52 = vpop.eup %2610  ;;  %v1595_v42 = vmul.f32 %v3734_v33, %v1379_v10  ;;  %v529_v10 = vadd.f32 %v4759_v26, %v459_v39  ;;  %v530_v43 = vadd.f32 %v4759_v26, %v460_v6 }
 0x23a   :  { %2441 = vmatprep.mubr.f32.mxu1 %v2611_v52  ;;  %v531_v4 = vadd.f32 %v4759_v26, %v461_v56 }
 0x23b   :  { %v1659_v28 = vadd.f32 %v1595_v42, %v1271_v34  ;;  %1562 = vperm.xlu1 %2554, %v2698_v16   ;;  %v4787_v16 = vld [vmem:[#allocation86_spill] sm:$0xff]  ;;  %v1662_v34 = vadd.f32 %v1598_v29, %v1274_v17  ;;  %v917_v22 = vadd.f32 %v853_v62, %v529_v10  ;;  %v4793_v42 = vld [vmem:[#allocation113_spill] sm:$0xff] }
 0x23c   :  { %v1507_v38 = vpop.permute.xlu1 %1506  ;;  %v821_v27 = vmul.f32 %v3713_v57, %v4787_v16  ;;  %v4803_v29 = vld [vmem:[#allocation65_spill] sm:$0xff] }
 0x23d   :  { %v2613_v5 = vpop.eup %2612  ;;  %2614 = vtanh.f32 %v1659_v28  ;;  %v1627_v54 = vmul.f32 %v3734_v33, %v1507_v38  ;;  %v1242_v38 = vmul.f32 %v3715_v35, %v4794_v45 }
 0x23e   :  { %2616 = vtanh.f32 %v1660_v61  ;;  %2442 = vmatmul.mubr.f32.gmra.mrb[12].mxu1 %v2613_v5  ;;  %v885_v0 = vadd.f32 %v821_v27, %v497_v41  ;;  %v854_v61 = vmul.f32 %v3713_v57, %v4793_v42  ;;  %v4799_v27 = vld [vmem:[#allocation143_spill] sm:$0xff] }
 0x23f   :  { %v1691_v24 = vadd.f32 %v1627_v54, %v1303_v50  ;;  %1566 = vperm.xlu1 %2554, %v2700_v58   ;;  %v2703_v54 = vld [vmem:[%s4489_s0 + $0x1f8] sm:$0xff]  ;;  %v1212_v59 = vmul.f32 %v3715_v35, %v4799_v27  ;;  %v4812_v27 = vld [vmem:[#allocation142_spill] sm:$0xff] }
 0x240   :  { %v1511_v15 = vpop.permute.xlu1 %1510  ;;  %v918_v7 = vadd.f32 %v854_v61, %v530_v43  ;;  %v4805_v61 = vld [vmem:[#allocation158_spill] sm:$0xff] }
 0x241   :  { %2618 = vtanh.f32 %v1691_v24  ;;  %v1628_v19 = vmul.f32 %v3734_v33, %v1511_v15  ;;  %v4795_v15 = vld [vmem:[#allocation33_spill] sm:$0xff] }
 0x242   :  { %v1306_v24 = vadd.f32 %v1242_v38, %v918_v7  ;;  %v4806_v7 = vld [vmem:[#allocation35_spill] sm:$0xff] }
 0x243   :  { %v1692_v2 = vadd.f32 %v1628_v19, %v1304_v46  ;;  %2555 = vset.pattern.permute.xlu1 %v4654_v8  ;;  %v430_v46 = vmul.f32 %v4762_v40, %v4795_v15  ;;  %v4796_v19 = vld [vmem:[#allocation34_spill] sm:$0xff] }
 0x244   :  { %1182 = vperm.xlu1 %2555, %v2701_v48   ;;  %v429_v23 = vmul.f32 %v4762_v40, %v4796_v19 }
 0x245   :  { %2620 = vtanh.f32 %v1692_v2  ;;  %v1127_v18 = vpop.permute.xlu1 %1126  ;;  %v4798_v2 = vld [vmem:[#allocation88_spill] sm:$0xff]  ;;  %v500_v16 = vadd.f32 %v4759_v26, %v430_v46  ;;  %v4809_v46 = vld [vmem:[#allocation90_spill] sm:$0xff] }
 0x246   :  { %v1241_v52 = vmul.f32 %v3715_v35, %v1127_v18  ;;  %v823_v36 = vmul.f32 %v3713_v57, %v4798_v2  ;;  %v499_v9 = vadd.f32 %v4759_v26, %v429_v23  ;;  %v825_v19 = vmul.f32 %v3713_v57, %v4809_v46  ;;  %v1407_v23 = vpop.permute.xlu0 %1406 }
 0x247   :  { %v2615_v8 = vpop.eup %2614  ;;  %v888_v39 = vadd.f32 %v824_v21, %v500_v16  ;;  %v4810_v21 = vld [vmem:[#allocation145_spill] sm:$0xff]  ;;  %v1602_v37 = vmul.f32 %v3734_v33, %v1407_v23 }
 0x248   :  { %v2617_v30 = vpop.eup %2616  ;;  %2557 = vset.pattern.permute.xlu1 %v4657_v63  ;;  %2396 = vmatprep.mubr.f32.mxu0 %v2615_v8  ;;  %v1273_v63 = vadd.f32 %v1209_v60, %v885_v0  ;;  %v1305_v5 = vadd.f32 %v1241_v52, %v917_v22  ;;  %v4801_v8 = vld [vmem:[#allocation140_spill] sm:$0xff]  ;;  %v887_v60 = vadd.f32 %v823_v36, %v499_v9 }
 0x249   :  { %1442 = vperm.xlu1 %2557, %v2702_v53   ;;  %2397 = vmatmul.mubr.f32.gmra.mrb[14].mxu0 %v2617_v30  ;;  %v1211_v41 = vmul.f32 %v3715_v35, %v4801_v8  ;;  %v4802_v30 = vld [vmem:[#allocation114_spill] sm:$0xff]  ;;  %v462_v0 = vmul.f32 %v4762_v40, %v4803_v29  ;;  %v1276_v25 = vadd.f32 %v1212_v59, %v888_v39  ;;  %v4813_v8 = vld [vmem:[#allocation116_spill] sm:$0xff] }
 0x24a   :  { %v1387_v47 = vpop.permute.xlu1 %1386  ;;  %v855_v1 = vmul.f32 %v3713_v57, %v4802_v30  ;;  %v1214_v2 = vmul.f32 %v3715_v35, %v4810_v21  ;;  %v1213_v59 = vmul.f32 %v3715_v35, %v4812_v27  ;;  %v4823_v21 = vld [vmem:[#allocation144_spill] sm:$0xff]  ;;  %v4824_v27 = vld [vmem:[#allocation118_spill] sm:$0xff] }
 0x24b   :  { %v2619_v32 = vpop.eup %2618  ;;  %v1597_v55 = vmul.f32 %v3734_v33, %v1387_v47  ;;  %v1275_v6 = vadd.f32 %v1211_v41, %v887_v60  ;;  %v857_v41 = vmul.f32 %v3713_v57, %v4813_v8 }
 0x24c   :  { %2444 = vmatprep.mubr.f32.mxu1 %v2619_v32  ;;  %v1664_v32 = vadd.f32 %v1600_v3, %v1276_v25  ;;  %v919_v10 = vadd.f32 %v855_v1, %v531_v4  ;;  %v4815_v4 = vld [vmem:[#allocation117_spill] sm:$0xff] }
 0x24d   :  { %v1661_v14 = vadd.f32 %v1597_v55, %v1273_v63  ;;  %1570 = vperm.xlu1 %2557, %v2701_v48   ;;  %v4804_v63 = vld [vmem:[#allocation115_spill] sm:$0xff] }
 0x24e   :  { %v1515_v49 = vpop.permute.xlu1 %1514  ;;  %v856_v52 = vmul.f32 %v3713_v57, %v4804_v63  ;;  %v4816_v63 = vld [vmem:[#allocation8_spill] sm:$0xff] }
 0x24f   :  { %v2621_v28 = vpop.eup %2620  ;;  %2622 = vtanh.f32 %v1661_v14  ;;  %v1629_v51 = vmul.f32 %v3734_v33, %v1515_v49  ;;  %v1244_v14 = vmul.f32 %v3715_v35, %v4805_v61 }
 0x250   :  { %2624 = vtanh.f32 %v1662_v34  ;;  %2445 = vmatmul.mubr.f32.gmra.mrb[14].mxu1 %v2621_v28  ;;  %v4215_v34 = vld [vmem:[%s4491_s2] ss:$0 sm:$0xff] }
 0x251   :  { %v1693_v50 = vadd.f32 %v1629_v51, %v1305_v5  ;;  %1574 = vperm.xlu1 %2557, %v2703_v54   ;;  %v532_v22 = vadd.f32 %v4215_v34, %v462_v0  ;;  %v4807_v54 = vld [vmem:[#allocation36_spill] sm:$0xff] }
 0x252   :  { %v1519_v13 = vpop.permute.xlu1 %1518 }
 0x253   :  { %2626 = vtanh.f32 %v1693_v50  ;;  %v1630_v58 = vmul.f32 %v3734_v33, %v1519_v13  ;;  %v920_v28 = vadd.f32 %v856_v52, %v532_v22  ;;  %v432_v50 = vmul.f32 %v4762_v40, %v4806_v7 }
 0x254   :  { %v431_v13 = vmul.f32 %v4762_v40, %v4807_v54  ;;  %v1246_v52 = vmul.f32 %v3715_v35, %v4816_v63 }
 0x255   :  { %v1694_v20 = vadd.f32 %v1630_v58, %v1306_v24  ;;  %v1308_v5 = vadd.f32 %v1244_v14, %v920_v28  ;;  %v4808_v58 = vld [vmem:[#allocation91_spill] sm:$0xff]  ;;  %v502_v12 = vadd.f32 %v4215_v34, %v432_v50  ;;  %v4820_v50 = vld [vmem:[#allocation92_spill] sm:$0xff] }
 0x256   :  { %v826_v15 = vmul.f32 %v3713_v57, %v4808_v58  ;;  %v501_v44 = vadd.f32 %v4215_v34, %v431_v13  ;;  %v827_v54 = vmul.f32 %v3713_v57, %v4820_v50  ;;  %v1415_v13 = vpop.permute.xlu0 %1414 }
 0x257   :  { %2628 = vtanh.f32 %v1694_v20  ;;  %v1135_v48 = vpop.permute.xlu1 %1134 }
 0x258   :  { %v1243_v17 = vmul.f32 %v3715_v35, %v1135_v48  ;;  %v4811_v48 = vld [vmem:[#allocation68_spill] sm:$0xff]  ;;  %v890_v9 = vadd.f32 %v826_v15, %v502_v12  ;;  %v889_v56 = vadd.f32 %v825_v19, %v501_v44  ;;  %v4821_v15 = vld [vmem:[#allocation147_spill] sm:$0xff] }
 0x259   :  { %v2623_v18 = vpop.eup %2622  ;;  %v463_v16 = vmul.f32 %v4762_v40, %v4811_v48  ;;  %v1216_v46 = vmul.f32 %v3715_v35, %v4821_v15  ;;  %v1604_v48 = vmul.f32 %v3734_v33, %v1415_v13  ;;  %v4834_v15 = vld [vmem:[#allocation146_spill] sm:$0xff] }
 0x25a   :  { %v2625_v11 = vpop.eup %2624  ;;  %2399 = vmatprep.mubr.f32.mxu0 %v2623_v18  ;;  %v1307_v43 = vadd.f32 %v1243_v17, %v919_v10  ;;  %v1278_v3 = vadd.f32 %v1214_v2, %v890_v9  ;;  %v1277_v29 = vadd.f32 %v1213_v59, %v889_v56  ;;  %v1215_v2 = vmul.f32 %v3715_v35, %v4823_v21  ;;  %v4835_v21 = vld [vmem:[#allocation120_spill] sm:$0xff] }
 0x25b   :  { %2400 = vmatmul.mubr.f32.gmra.mrb[16].mxu0 %v2625_v11  ;;  %v4814_v11 = vld [vmem:[#allocation67_spill] sm:$0xff]  ;;  %v533_v1 = vadd.f32 %v4215_v34, %v463_v16  ;;  %v859_v59 = vmul.f32 %v3713_v57, %v4824_v27 }
 0x25c   :  { %v1395_v62 = vpop.permute.xlu1 %1394  ;;  %v464_v39 = vmul.f32 %v4762_v40, %v4814_v11 }
 0x25d   :  { %v2627_v53 = vpop.eup %2626  ;;  %v1599_v47 = vmul.f32 %v3734_v33, %v1395_v62  ;;  %v1666_v62 = vadd.f32 %v1602_v37, %v1278_v3 }
 0x25e   :  { %2447 = vmatprep.mubr.f32.mxu1 %v2627_v53  ;;  %v921_v53 = vadd.f32 %v857_v41, %v533_v1  ;;  %v4826_v1 = vld [vmem:[#allocation119_spill] sm:$0xff] }
 0x25f   :  { %v1663_v55 = vadd.f32 %v1599_v47, %v1275_v6  ;;  %v858_v6 = vmul.f32 %v3713_v57, %v4815_v4  ;;  %v534_v47 = vadd.f32 %v4215_v34, %v464_v39  ;;  %v4827_v4 = vld [vmem:[#allocation15_spill] sm:$0xff] }
 0x260   :  { %v1523_v26 = vpop.permute.xlu1 %1522 }
 0x261   :  { %v2629_v42 = vpop.eup %2628  ;;  %2630 = vtanh.f32 %v1663_v55  ;;  %v1631_v49 = vmul.f32 %v3734_v33, %v1523_v26  ;;  %v922_v26 = vadd.f32 %v858_v6, %v534_v47  ;;  %v1248_v6 = vmul.f32 %v3715_v35, %v4827_v4 }
 0x262   :  { %2632 = vtanh.f32 %v1664_v32  ;;  %2448 = vmatmul.mubr.f32.gmra.mrb[16].mxu1 %v2629_v42 }
 0x263   :  { %v1695_v45 = vadd.f32 %v1631_v49, %v1307_v43  ;;  %v1310_v14 = vadd.f32 %v1246_v52, %v922_v26  ;;  %v4817_v49 = vld [vmem:[#allocation37_spill] sm:$0xff] }
 0x264   :  { %v1527_v38 = vpop.permute.xlu1 %1526  ;;  %v434_v28 = vmul.f32 %v4762_v40, %v4817_v49 }
 0x265   :  { %2634 = vtanh.f32 %v1695_v45  ;;  %v1632_v51 = vmul.f32 %v3734_v33, %v1527_v38  ;;  %v4818_v45 = vld [vmem:[#allocation38_spill] sm:$0xff] }
 0x266   :  { %v433_v38 = vmul.f32 %v4762_v40, %v4818_v45  ;;  %v504_v58 = vadd.f32 %v4215_v34, %v434_v28  ;;  %v4831_v28 = vld [vmem:[#allocation94_spill] sm:$0xff] }
 0x267   :  { %v1696_v24 = vadd.f32 %v1632_v51, %v1308_v5  ;;  %v4819_v51 = vld [vmem:[#allocation93_spill] sm:$0xff]  ;;  %v829_v45 = vmul.f32 %v3713_v57, %v4831_v28 }
 0x268   :  { %v828_v7 = vmul.f32 %v3713_v57, %v4819_v51  ;;  %v503_v23 = vadd.f32 %v4215_v34, %v433_v38  ;;  %v1423_v38 = vpop.permute.xlu0 %1422 }
 0x269   :  { %2636 = vtanh.f32 %v1696_v24  ;;  %v1143_v20 = vpop.permute.xlu1 %1142 }
 0x26a   :  { %v1245_v0 = vmul.f32 %v3715_v35, %v1143_v20  ;;  %v4822_v20 = vld [vmem:[#allocation70_spill] sm:$0xff]  ;;  %v892_v44 = vadd.f32 %v828_v7, %v504_v58  ;;  %v891_v16 = vadd.f32 %v827_v54, %v503_v23  ;;  %v4832_v7 = vld [vmem:[#allocation5_spill] sm:$0xff] }
 0x26b   :  { %v2631_v36 = vpop.eup %2630  ;;  %v465_v12 = vmul.f32 %v4762_v40, %v4822_v20  ;;  %v1218_v50 = vmul.f32 %v3715_v35, %v4832_v7  ;;  %v1606_v20 = vmul.f32 %v3734_v33, %v1423_v38  ;;  %v4845_v7 = vld [vmem:[#allocation148_spill] sm:$0xff] }
 0x26c   :  { %v2633_v18 = vpop.eup %2632  ;;  %2402 = vmatprep.mubr.f32.mxu0 %v2631_v36  ;;  %v1309_v55 = vadd.f32 %v1245_v0, %v921_v53  ;;  %v1280_v37 = vadd.f32 %v1216_v46, %v892_v44  ;;  %v1279_v11 = vadd.f32 %v1215_v2, %v891_v16  ;;  %v1217_v46 = vmul.f32 %v3715_v35, %v4834_v15  ;;  %v4846_v15 = vld [vmem:[#allocation122_spill] sm:$0xff] }
 0x26d   :  { %2403 = vmatmul.mubr.f32.gmra.mrb[18].mxu0 %v2633_v18  ;;  %v4825_v18 = vld [vmem:[#allocation69_spill] sm:$0xff]  ;;  %v535_v41 = vadd.f32 %v4215_v34, %v465_v12  ;;  %v861_v2 = vmul.f32 %v3713_v57, %v4835_v21 }
 0x26e   :  { %v1403_v60 = vpop.permute.xlu1 %1402  ;;  %v466_v9 = vmul.f32 %v4762_v40, %v4825_v18 }
 0x26f   :  { %v2635_v30 = vpop.eup %2634  ;;  %v1601_v25 = vmul.f32 %v3734_v33, %v1403_v60  ;;  %v1668_v60 = vadd.f32 %v1604_v48, %v1280_v37 }
 0x270   :  { %2450 = vmatprep.mubr.f32.mxu1 %v2635_v30  ;;  %v923_v30 = vadd.f32 %v859_v59, %v535_v41  ;;  %v4837_v41 = vld [vmem:[#allocation121_spill] sm:$0xff] }
 0x271   :  { %v1665_v17 = vadd.f32 %v1601_v25, %v1277_v29  ;;  %v860_v29 = vmul.f32 %v3713_v57, %v4826_v1  ;;  %v536_v25 = vadd.f32 %v4215_v34, %v466_v9  ;;  %v4838_v1 = vld [vmem:[#allocation19_spill] sm:$0xff] }
 0x272   :  { %v1531_v32 = vpop.permute.xlu1 %1530 }
 0x273   :  { %v2637_v10 = vpop.eup %2636  ;;  %2638 = vtanh.f32 %v1665_v17  ;;  %v1633_v22 = vmul.f32 %v3734_v33, %v1531_v32  ;;  %v924_v32 = vadd.f32 %v860_v29, %v536_v25  ;;  %v1250_v29 = vmul.f32 %v3715_v35, %v4838_v1 }
 0x274   :  { %2640 = vtanh.f32 %v1666_v62  ;;  %2451 = vmatmul.mubr.f32.gmra.mrb[18].mxu1 %v2637_v10 }
 0x275   :  { %v1697_v42 = vadd.f32 %v1633_v22, %v1309_v55  ;;  %v1312_v52 = vadd.f32 %v1248_v6, %v924_v32  ;;  %v4828_v22 = vld [vmem:[#allocation39_spill] sm:$0xff] }
 0x276   :  { %v1535_v61 = vpop.permute.xlu1 %1534  ;;  %v436_v26 = vmul.f32 %v4762_v40, %v4828_v22 }
 0x277   :  { %2642 = vtanh.f32 %v1697_v42  ;;  %v1634_v43 = vmul.f32 %v3734_v33, %v1535_v61  ;;  %v4829_v42 = vld [vmem:[#allocation40_spill] sm:$0xff] }
 0x278   :  { %v435_v61 = vmul.f32 %v4762_v40, %v4829_v42  ;;  %v506_v51 = vadd.f32 %v4215_v34, %v436_v26  ;;  %v4842_v26 = vld [vmem:[#allocation96_spill] sm:$0xff] }
 0x279   :  { %v1698_v5 = vadd.f32 %v1634_v43, %v1310_v14  ;;  %v4830_v43 = vld [vmem:[#allocation95_spill] sm:$0xff]  ;;  %v831_v42 = vmul.f32 %v3713_v57, %v4842_v26 }
 0x27a   :  { %v830_v49 = vmul.f32 %v3713_v57, %v4830_v43  ;;  %v505_v13 = vadd.f32 %v4215_v34, %v435_v61  ;;  %v1431_v61 = vpop.permute.xlu0 %1430 }
 0x27b   :  { %2644 = vtanh.f32 %v1698_v5  ;;  %v1151_v24 = vpop.permute.xlu1 %1150 }
 0x27c   :  { %v1247_v39 = vmul.f32 %v3715_v35, %v1151_v24  ;;  %v4833_v24 = vld [vmem:[#allocation72_spill] sm:$0xff]  ;;  %v894_v23 = vadd.f32 %v830_v49, %v506_v51  ;;  %v893_v12 = vadd.f32 %v829_v45, %v505_v13  ;;  %v4843_v49 = vld [vmem:[#allocation150_spill] sm:$0xff] }
 0x27d   :  { %v2639_v19 = vpop.eup %2638  ;;  %v467_v58 = vmul.f32 %v4762_v40, %v4833_v24  ;;  %v1220_v28 = vmul.f32 %v3715_v35, %v4843_v49  ;;  %v1608_v24 = vmul.f32 %v3734_v33, %v1431_v61  ;;  %v4856_v49 = vld [vmem:[#allocation149_spill] sm:$0xff] }
 0x27e   :  { %v2641_v36 = vpop.eup %2640  ;;  %2405 = vmatprep.mubr.f32.mxu0 %v2639_v19  ;;  %v1311_v17 = vadd.f32 %v1247_v39, %v923_v30  ;;  %v1282_v48 = vadd.f32 %v1218_v50, %v894_v23  ;;  %v1281_v18 = vadd.f32 %v1217_v46, %v893_v12  ;;  %v1219_v50 = vmul.f32 %v3715_v35, %v4845_v7  ;;  %v4857_v7 = vld [vmem:[#allocation124_spill] sm:$0xff] }
 0x27f   :  { %2406 = vmatmul.mubr.f32.gmra.mrb[20].mxu0 %v2641_v36  ;;  %v4836_v36 = vld [vmem:[#allocation71_spill] sm:$0xff]  ;;  %v537_v59 = vadd.f32 %v4215_v34, %v467_v58  ;;  %v863_v46 = vmul.f32 %v3713_v57, %v4846_v15 }
 0x280   :  { %v1411_v56 = vpop.permute.xlu1 %1410  ;;  %v468_v44 = vmul.f32 %v4762_v40, %v4836_v36 }
 0x281   :  { %v2643_v8 = vpop.eup %2642  ;;  %v1603_v3 = vmul.f32 %v3734_v33, %v1411_v56  ;;  %v1670_v56 = vadd.f32 %v1606_v20, %v1282_v48 }
 0x282   :  { %2453 = vmatprep.mubr.f32.mxu1 %v2643_v8  ;;  %v925_v8 = vadd.f32 %v861_v2, %v537_v59  ;;  %v4848_v59 = vld [vmem:[#allocation123_spill] sm:$0xff] }
 0x283   :  { %v1667_v0 = vadd.f32 %v1603_v3, %v1279_v11  ;;  %v862_v11 = vmul.f32 %v3713_v57, %v4837_v41  ;;  %v538_v3 = vadd.f32 %v4215_v34, %v468_v44  ;;  %v4849_v41 = vld [vmem:[#allocation22_spill] sm:$0xff] }
 0x284   :  { %v1539_v62 = vpop.permute.xlu1 %1538 }
 0x285   :  { %v2645_v53 = vpop.eup %2644  ;;  %2646 = vtanh.f32 %v1667_v0  ;;  %v1635_v47 = vmul.f32 %v3734_v33, %v1539_v62  ;;  %v926_v62 = vadd.f32 %v862_v11, %v538_v3  ;;  %v1252_v11 = vmul.f32 %v3715_v35, %v4849_v41 }
 0x286   :  { %2648 = vtanh.f32 %v1668_v60  ;;  %2454 = vmatmul.mubr.f32.gmra.mrb[20].mxu1 %v2645_v53 }
 0x287   :  { %v1699_v10 = vadd.f32 %v1635_v47, %v1311_v17  ;;  %v1314_v6 = vadd.f32 %v1250_v29, %v926_v62  ;;  %v4839_v47 = vld [vmem:[#allocation41_spill] sm:$0xff] }
 0x288   :  { %v1543_v63 = vpop.permute.xlu1 %1542  ;;  %v438_v32 = vmul.f32 %v4762_v40, %v4839_v47 }
 0x289   :  { %2650 = vtanh.f32 %v1699_v10  ;;  %v1636_v55 = vmul.f32 %v3734_v33, %v1543_v63  ;;  %v4840_v10 = vld [vmem:[#allocation42_spill] sm:$0xff] }
 0x28a   :  { %v437_v63 = vmul.f32 %v4762_v40, %v4840_v10  ;;  %v508_v43 = vadd.f32 %v4215_v34, %v438_v32  ;;  %v4853_v32 = vld [vmem:[#allocation98_spill] sm:$0xff] }
 0x28b   :  { %v1700_v14 = vadd.f32 %v1636_v55, %v1312_v52  ;;  %v4841_v55 = vld [vmem:[#allocation97_spill] sm:$0xff]  ;;  %v833_v10 = vmul.f32 %v3713_v57, %v4853_v32 }
 0x28c   :  { %v832_v22 = vmul.f32 %v3713_v57, %v4841_v55  ;;  %v507_v38 = vadd.f32 %v4215_v34, %v437_v63  ;;  %v1439_v63 = vpop.permute.xlu0 %1438 }
 0x28d   :  { %2652 = vtanh.f32 %v1700_v14  ;;  %v1159_v5 = vpop.permute.xlu1 %1158 }
 0x28e   :  { %v1249_v9 = vmul.f32 %v3715_v35, %v1159_v5  ;;  %v4844_v5 = vld [vmem:[#allocation73_spill] sm:$0xff]  ;;  %v896_v13 = vadd.f32 %v832_v22, %v508_v43  ;;  %v895_v58 = vadd.f32 %v831_v42, %v507_v38  ;;  %v4854_v22 = vld [vmem:[#allocation152_spill] sm:$0xff] }
 0x28f   :  { %v2647_v54 = vpop.eup %2646  ;;  %v469_v51 = vmul.f32 %v4762_v40, %v4844_v5  ;;  %v1222_v26 = vmul.f32 %v3715_v35, %v4854_v22  ;;  %v1610_v5 = vmul.f32 %v3734_v33, %v1439_v63 }
 0x290   :  { %v2649_v19 = vpop.eup %2648  ;;  %2408 = vmatprep.mubr.f32.mxu0 %v2647_v54  ;;  %v1313_v0 = vadd.f32 %v1249_v9, %v925_v8  ;;  %v1284_v20 = vadd.f32 %v1220_v28, %v896_v13  ;;  %v1283_v36 = vadd.f32 %v1219_v50, %v895_v58  ;;  %v1221_v28 = vmul.f32 %v3715_v35, %v4856_v49 }
 0x291   :  { %2409 = vmatmul.mubr.f32.gmra.mrb[22].mxu0 %v2649_v19  ;;  %v4847_v19 = vld [vmem:[#allocation9_spill] sm:$0xff]  ;;  %v539_v2 = vadd.f32 %v4215_v34, %v469_v51  ;;  %v865_v50 = vmul.f32 %v3713_v57, %v4857_v7 }
 0x292   :  { %v1419_v16 = vpop.permute.xlu1 %1418  ;;  %v470_v23 = vmul.f32 %v4762_v40, %v4847_v19 }
 0x293   :  { %v2651_v27 = vpop.eup %2650  ;;  %v1605_v37 = vmul.f32 %v3734_v33, %v1419_v16  ;;  %v1672_v16 = vadd.f32 %v1608_v24, %v1284_v20 }
 0x294   :  { %2456 = vmatprep.mubr.f32.mxu1 %v2651_v27  ;;  %v927_v27 = vadd.f32 %v863_v46, %v539_v2  ;;  %v4859_v2 = vld [vmem:[#allocation125_spill] sm:$0xff] }
 0x295   :  { %v1669_v39 = vadd.f32 %v1605_v37, %v1281_v18  ;;  %v864_v18 = vmul.f32 %v3713_v57, %v4848_v59  ;;  %v540_v37 = vadd.f32 %v4215_v34, %v470_v23 }
 0x296   :  { %v1547_v60 = vpop.permute.xlu1 %1546 }
 0x297   :  { %v2653_v30 = vpop.eup %2652  ;;  %2654 = vtanh.f32 %v1669_v39  ;;  %v1637_v25 = vmul.f32 %v3734_v33, %v1547_v60  ;;  %v928_v60 = vadd.f32 %v864_v18, %v540_v37  ;;  %v4860_v18 = vld [vmem:[#allocation24_spill] sm:$0xff] }
 0x298   :  { %2656 = vtanh.f32 %v1670_v56  ;;  %2457 = vmatmul.mubr.f32.gmra.mrb[22].mxu1 %v2653_v30 }
 0x299   :  { %v1701_v53 = vadd.f32 %v1637_v25, %v1313_v0  ;;  %v1316_v29 = vadd.f32 %v1252_v11, %v928_v60  ;;  %v4850_v25 = vld [vmem:[#allocation43_spill] sm:$0xff] }
 0x29a   :  { %v1551_v4 = vpop.permute.xlu1 %1550  ;;  %v440_v62 = vmul.f32 %v4762_v40, %v4850_v25 }
 0x29b   :  { %2658 = vtanh.f32 %v1701_v53  ;;  %v1638_v17 = vmul.f32 %v3734_v33, %v1551_v4  ;;  %v4851_v53 = vld [vmem:[#allocation44_spill] sm:$0xff] }
 0x29c   :  { %v439_v4 = vmul.f32 %v4762_v40, %v4851_v53  ;;  %v510_v55 = vadd.f32 %v4215_v34, %v440_v62  ;;  %v4862_v62 = vld [vmem:[#allocation46_spill] sm:$0xff] }
 0x29d   :  { %v1702_v52 = vadd.f32 %v1638_v17, %v1314_v6  ;;  %v4852_v17 = vld [vmem:[#allocation99_spill] sm:$0xff]  ;;  %v441_v53 = vmul.f32 %v4762_v40, %v4862_v62 }
 0x29e   :  { %v834_v47 = vmul.f32 %v3713_v57, %v4852_v17  ;;  %v509_v61 = vadd.f32 %v4215_v34, %v439_v4 }
 0x29f   :  { %2660 = vtanh.f32 %v1702_v52  ;;  %v1167_v14 = vpop.permute.xlu1 %1166 }
 0x2a0   :  { %v1251_v44 = vmul.f32 %v3715_v35, %v1167_v14  ;;  %v4855_v14 = vld [vmem:[#allocation10_spill] sm:$0xff]  ;;  %v898_v38 = vadd.f32 %v834_v47, %v510_v55  ;;  %v897_v51 = vadd.f32 %v833_v10, %v509_v61  ;;  %v4864_v47 = vld [vmem:[#allocation100_spill] sm:$0xff]  ;;  %v1447_v10 = vpop.permute.xlu0 %1446  ;;  %v4865_v55 = vld [vmem:[#allocation153_spill] sm:$0xff] }
 0x2a1   :  { %v2655_v45 = vpop.eup %2654  ;;  %v471_v43 = vmul.f32 %v4762_v40, %v4855_v14  ;;  %v835_v32 = vmul.f32 %v3713_v57, %v4864_v47  ;;  %v1224_v22 = vmul.f32 %v3715_v35, %v4865_v55  ;;  %v4866_v61 = vld [vmem:[#allocation12_spill] sm:$0xff] }
 0x2a2   :  { %v2657_v54 = vpop.eup %2656  ;;  %2411 = vmatprep.mubr.f32.mxu0 %v2655_v45  ;;  %v1315_v39 = vadd.f32 %v1251_v44, %v927_v27  ;;  %v1286_v24 = vadd.f32 %v1222_v26, %v898_v38  ;;  %v1285_v19 = vadd.f32 %v1221_v28, %v897_v51  ;;  %v473_v14 = vmul.f32 %v4762_v40, %v4866_v61  ;;  %v4868_v51 = vld [vmem:[#allocation126_spill] sm:$0xff] }
 0x2a3   :  { %2412 = vmatmul.mubr.f32.gmra.mrb[24].mxu0 %v2657_v54  ;;  %v4858_v54 = vld [vmem:[#allocation11_spill] sm:$0xff]  ;;  %v541_v46 = vadd.f32 %v4215_v34, %v471_v43  ;;  %v1612_v38 = vmul.f32 %v3734_v33, %v1447_v10  ;;  %v867_v7 = vmul.f32 %v3713_v57, %v4868_v51 }
 0x2a4   :  { %v1427_v12 = vpop.permute.xlu1 %1426  ;;  %v472_v13 = vmul.f32 %v4762_v40, %v4858_v54  ;;  %v4867_v43 = vld [vmem:[#allocation151_spill] sm:$0xff] }
 0x2a5   :  { %v2659_v21 = vpop.eup %2658  ;;  %v1607_v48 = vmul.f32 %v3734_v33, %v1427_v12  ;;  %v1674_v12 = vadd.f32 %v1610_v5, %v1286_v24  ;;  %v1223_v49 = vmul.f32 %v3715_v35, %v4867_v43 }
 0x2a6   :  { %2459 = vmatprep.mubr.f32.mxu1 %v2659_v21  ;;  %v929_v21 = vadd.f32 %v865_v50, %v541_v46  ;;  %v4869_v50 = vld [vmem:[#allocation13_spill] sm:$0xff] }
 0x2a7   :  { %v1671_v9 = vadd.f32 %v1607_v48, %v1283_v36  ;;  %v866_v36 = vmul.f32 %v3713_v57, %v4859_v2  ;;  %v4375_v48 = vld [vmem:[%s4493_s4] ss:$0 sm:$0xff]  ;;  %v474_v54 = vmul.f32 %v4762_v40, %v4869_v50  ;;  %s2733_s4 = smov [#allocation2]  }
 0x2a8   :  { %v1555_v56 = vpop.permute.xlu1 %1554  ;;  %s2250_s16 = sshll.u32 %s2733_s4, 4  ;;  %s2251_s16 = int_to_ptr.vmem [resolvable:$true] %s2250_s16 }
 0x2a9   :  { %v2661_v8 = vpop.eup %2660  ;;  %2662 = vtanh.f32 %v1671_v9  ;;  %v1639_v3 = vmul.f32 %v3734_v33, %v1555_v56  ;;  %v1254_v9 = vmul.f32 %v3715_v35, %v4860_v18  ;;  %s2705_s17 = scalar_lea.vmem %s2251_s16, 8192  ;;  %p2710_p1 = scmp.lt.s32.totalorder %s2251_s16, %s2251_s16 }
 0x2aa   :  { %2664 = vtanh.f32 %v1672_v16  ;;  %2460 = vmatmul.mubr.f32.gmra.mrb[24].mxu1 %v2661_v8  ;;  %v542_v16 = vadd.f32 %v4215_v34, %v472_v13  ;;  %p2706_p0 = scmp.ne.s32.totalorder %s2251_s16, %s2705_s17  ;;  %p2711_p2 = scmp.lt.s32.totalorder %s2705_s17, %s2705_s17 }
 0x2ab   :  { %v1703_v30 = vadd.f32 %v1639_v3, %v1315_v39 }
 0x2ac   :  { %v1559_v1 = vpop.permute.xlu1 %1558  ;;  %v930_v39 = vadd.f32 %v866_v36, %v542_v16  ;;  %p2712_p3 = por %p2711_p2, %p2710_p1 }
 0x2ad   :  { %2666 = vtanh.f32 %v1703_v30  ;;  %v1640_v0 = vmul.f32 %v3734_v33, %v1559_v1 }
 0x2ae   :  { %v1318_v1 = vadd.f32 %v1254_v9, %v930_v39  ;;  %p2713_p4 = pnand %p2712_p3, %p2706_p0 }
 0x2af   :  { %v1704_v6 = vadd.f32 %v1640_v0, %v1316_v29  ;;  %v4861_v0 = vld [vmem:[#allocation45_spill] sm:$0xff] }
 0x2b0   :  { %v442_v25 = vmul.f32 %v4762_v40, %v4861_v0 }
 0x2b1   :  { %2668 = vtanh.f32 %v1704_v6  ;;  %v1175_v52 = vpop.permute.xlu1 %1174  ;;  %v4863_v6 = vld [vmem:[#allocation101_spill] sm:$0xff] }
 0x2b2   :  { %v1253_v23 = vmul.f32 %v3715_v35, %v1175_v52  ;;  %v836_v17 = vmul.f32 %v3713_v57, %v4863_v6  ;;  %v512_v52 = vadd.f32 %v4215_v34, %v442_v25 }
 0x2b3   :  { %v2663_v42 = vpop.eup %2662 }
 0x2b4   :  { %v2665_v45 = vpop.eup %2664  ;;  %2414 = vmatprep.mubr.f32.mxu0 %v2663_v42  ;;  %v1317_v37 = vadd.f32 %v1253_v23, %v929_v21  ;;  %v511_v42 = vadd.f32 %v4215_v34, %v441_v53  ;;  %v4870_v21 = vld [vmem:[#allocation127_spill] sm:$0xff] }
 0x2b5   :  { %2415 = vmatmul.mubr.f32.gmra.mrb[26].mxu0 %v2665_v45  ;;  %v900_v45 = vadd.f32 %v836_v17, %v512_v52  ;;  %v868_v2 = vmul.f32 %v3713_v57, %v4870_v21 }
 0x2b6   :  { %v1435_v58 = vpop.permute.xlu1 %1434  ;;  %v899_v5 = vadd.f32 %v835_v32, %v511_v42 }
 0x2b7   :  { %v2667_v15 = vpop.eup %2666  ;;  %v1609_v20 = vmul.f32 %v3734_v33, %v1435_v58  ;;  %v1288_v13 = vadd.f32 %v1224_v22, %v900_v45 }
 0x2b8   :  { %2462 = vmatprep.mubr.f32.mxu1 %v2667_v15  ;;  %v543_v15 = vadd.f32 %v4215_v34, %v473_v14  ;;  %v1287_v46 = vadd.f32 %v1223_v49, %v899_v5 }
 0x2b9   :  { %v1673_v44 = vadd.f32 %v1609_v20, %v1285_v19  ;;  %v1676_v20 = vadd.f32 %v1612_v38, %v1288_v13 }
 0x2ba   :  { %v1563_v27 = vpop.permute.xlu1 %1562 }
 0x2bb   :  { %v2669_v59 = vpop.eup %2668  ;;  %2670 = vtanh.f32 %v1673_v44  ;;  %v1641_v56 = vmul.f32 %v3734_v33, %v1563_v27  ;;  %v2377_v8 = vpop.f32.mrb[0].mxu0  ;;  %v544_v44 = vadd.f32 %v4215_v34, %v474_v54  ;;  %v1256_v27 = vmul.f32 %v3715_v35, %v3923_v31 }
 0x2bc   :  { %2672 = vtanh.f32 %v1674_v12  ;;  %v1868_v41 = vadd.f32 %v2377_v8, %v4375_v48  ;;  %v1862_v11 = vpop.f32.mrb[1].mxu0  ;;  %2463 = vmatmul.mubr.f32.gmra.mrb[26].mxu1 %v2669_v59  ;;  %v931_v12 = vadd.f32 %v867_v7, %v543_v15 }
 0x2bd   :  { %v1705_v3 = vadd.f32 %v1641_v56, %v1317_v37  ;;  %v1863_v60 = vadd.f32 %v4375_v48, %v1862_v11  ;;  %v932_v9 = vadd.f32 %v868_v2, %v544_v44 }
 0x2be   :  { %2182 = vst [vmem:[#allocation2 + $0x8] sm:$0xff] %v1868_v41  ;;  %v1567_v30 = vpop.permute.xlu1 %1566 }
 0x2bf   :  { %2674 = vtanh.f32 %v1705_v3  ;;  %2181 = vst [vmem:[#allocation2] sm:$0xff] %v1863_v60  ;;  %v1642_v29 = vmul.f32 %v3734_v33, %v1567_v30  ;;  %v1320_v8 = vadd.f32 %v1256_v27, %v932_v9 }
 0x2c1   :  { %v1706_v4 = vadd.f32 %v1642_v29, %v1318_v1 }
 0x2c3   :  { %2676 = vtanh.f32 %v1706_v4  ;;  %v1183_v63 = vpop.permute.xlu1 %1182 }
 0x2c4   :  { %v1255_v19 = vmul.f32 %v3715_v35, %v1183_v63 }
 0x2c5   :  { %v2671_v26 = vpop.eup %2670 }
 0x2c6   :  { %v2673_v28 = vpop.eup %2672  ;;  %2417 = vmatprep.mubr.f32.mxu0 %v2671_v26  ;;  %v1319_v59 = vadd.f32 %v1255_v19, %v931_v12 }
 0x2c7   :  { %2418 = vmatmul.mubr.f32.gmra.mrb[28].mxu0 %v2673_v28 }
 0x2c8   :  { %v1443_v24 = vpop.permute.xlu1 %1442 }
 0x2c9   :  { %v2675_v58 = vpop.eup %2674  ;;  %v1611_v23 = vmul.f32 %v3734_v33, %v1443_v24 }
 0x2ca   :  { %2465 = vmatprep.mubr.f32.mxu1 %v2675_v58 }
 0x2cb   :  { %v1675_v36 = vadd.f32 %v1611_v23, %v1287_v46 }
 0x2cc   :  { %v1571_v40 = vpop.permute.xlu1 %1570 }
 0x2cd   :  { %v2677_v16 = vpop.eup %2676  ;;  %2678 = vtanh.f32 %v1675_v36  ;;  %v1643_v18 = vmul.f32 %v3734_v33, %v1571_v40 }
 0x2ce   :  { %2680 = vtanh.f32 %v1676_v20  ;;  %2466 = vmatmul.mubr.f32.gmra.mrb[28].mxu1 %v2677_v16 }
 0x2cf   :  { %v1707_v37 = vadd.f32 %v1643_v18, %v1319_v59 }
 0x2d0   :  { %v1575_v56 = vpop.permute.xlu1 %1574 }
 0x2d1   :  { %2682 = vtanh.f32 %v1707_v37  ;;  %v1644_v57 = vmul.f32 %v3734_v33, %v1575_v56 }
 0x2d3   :  { %v1708_v41 = vadd.f32 %v1644_v57, %v1320_v8 }
 0x2d5   :  { %2684 = vtanh.f32 %v1708_v41 }
 0x2d7   :  { %v2679_v34 = vpop.eup %2678 }
 0x2d8   :  { %v2681_v11 = vpop.eup %2680  ;;  %2420 = vmatprep.mubr.f32.mxu0 %v2679_v34 }
 0x2d9   :  { %2421 = vmatmul.mubr.f32.gmra.mrb[30].mxu0 %v2681_v11 }
 0x2db   :  { %v2683_v35 = vpop.eup %2682 }
 0x2dc   :  { %2468 = vmatprep.mubr.f32.mxu1 %v2683_v35 }
 0x2df   :  { %v2685_v31 = vpop.eup %2684 }
 0x2e0   :  { %2469 = vmatmul.mubr.f32.gmra.mrb[30].mxu1 %v2685_v31 }
 0x2e8   :  { %v2425_v39 = vpop.f32.mrb[0].mxu1 }
 0x2e9   :  { %v2028_v3 = vadd.f32 %v2425_v39, %v4375_v48  ;;  %v2022_v60 = vpop.f32.mrb[1].mxu1 }
 0x2ea   :  { %v2023_v30 = vadd.f32 %v4375_v48, %v2022_v60 }
 0x2eb   :  { %2214 = vst [vmem:[#allocation2 + $0x108] sm:$0xff] %v2028_v3 }
 0x2ec   :  { %2213 = vst [vmem:[#allocation2 + $0x100] sm:$0xff] %v2023_v30  ;;  %v2428_v1 = vpop.f32.mrb[2].mxu1 }
 0x2ed   :  { %v2038_v33 = vadd.f32 %v2428_v1, %v4375_v48  ;;  %v2032_v29 = vpop.f32.mrb[3].mxu1 }
 0x2ee   :  { %v2033_v0 = vadd.f32 %v4375_v48, %v2032_v29 }
 0x2ef   :  { %2216 = vst [vmem:[#allocation2 + $0x118] sm:$0xff] %v2038_v33  ;;  %v2380_v25 = vpop.f32.mrb[2].mxu0 }
 0x2f0   :  { %2215 = vst [vmem:[#allocation2 + $0x110] sm:$0xff] %v2033_v0  ;;  %v1878_v62 = vadd.f32 %v2380_v25, %v4375_v48  ;;  %v1872_v53 = vpop.f32.mrb[3].mxu0  ;;  %v2431_v4 = vpop.f32.mrb[4].mxu1 }
 0x2f1   :  { %v1873_v6 = vadd.f32 %v4375_v48, %v1872_v53  ;;  %v2048_v17 = vadd.f32 %v2431_v4, %v4375_v48  ;;  %v2042_v47 = vpop.f32.mrb[5].mxu1 }
 0x2f2   :  { %2184 = vst [vmem:[#allocation2 + $0x18] sm:$0xff] %v1878_v62  ;;  %v2043_v32 = vadd.f32 %v4375_v48, %v2042_v47 }
 0x2f3   :  { %2183 = vst [vmem:[#allocation2 + $0x10] sm:$0xff] %v1873_v6  ;;  %2218 = vst [vmem:[#allocation2 + $0x128] sm:$0xff] %v2048_v17 }
 0x2f4   :  { %2217 = vst [vmem:[#allocation2 + $0x120] sm:$0xff] %v2043_v32  ;;  %v2434_v10 = vpop.f32.mrb[6].mxu1 }
 0x2f5   :  { %v2058_v63 = vadd.f32 %v2434_v10, %v4375_v48  ;;  %v2052_v52 = vpop.f32.mrb[7].mxu1 }
 0x2f6   :  { %v2053_v55 = vadd.f32 %v4375_v48, %v2052_v52 }
 0x2f7   :  { %2220 = vst [vmem:[#allocation2 + $0x138] sm:$0xff] %v2058_v63 }
 0x2f8   :  { %2219 = vst [vmem:[#allocation2 + $0x130] sm:$0xff] %v2053_v55  ;;  %v2383_v22 = vpop.f32.mrb[4].mxu0 }
 0x2f9   :  { %v1888_v26 = vadd.f32 %v2383_v22, %v4375_v48  ;;  %v1882_v42 = vpop.f32.mrb[5].mxu0  ;;  %v2437_v61 = vpop.f32.mrb[8].mxu1 }
 0x2fa   :  { %v1883_v14 = vadd.f32 %v4375_v48, %v1882_v42  ;;  %v2068_v43 = vadd.f32 %v2437_v61, %v4375_v48  ;;  %v2062_v49 = vpop.f32.mrb[9].mxu1 }
 0x2fb   :  { %2186 = vst [vmem:[#allocation2 + $0x28] sm:$0xff] %v1888_v26  ;;  %v2063_v28 = vadd.f32 %v4375_v48, %v2062_v49 }
 0x2fc   :  { %2185 = vst [vmem:[#allocation2 + $0x20] sm:$0xff] %v1883_v14  ;;  %2222 = vst [vmem:[#allocation2 + $0x148] sm:$0xff] %v2068_v43  ;;  %v2386_v45 = vpop.f32.mrb[6].mxu0 }
 0x2fd   :  { %2221 = vst [vmem:[#allocation2 + $0x140] sm:$0xff] %v2063_v28  ;;  %v1898_v38 = vadd.f32 %v2386_v45, %v4375_v48  ;;  %v1892_v5 = vpop.f32.mrb[7].mxu0 }
 0x2fe   :  { %v1893_v51 = vadd.f32 %v4375_v48, %v1892_v5 }
 0x2ff   :  { %2188 = vst [vmem:[#allocation2 + $0x38] sm:$0xff] %v1898_v38  ;;  %v2440_v7 = vpop.f32.mrb[10].mxu1 }
 0x300   :  { %2187 = vst [vmem:[#allocation2 + $0x30] sm:$0xff] %v1893_v51  ;;  %v2389_v50 = vpop.f32.mrb[8].mxu0  ;;  %v2078_v54 = vadd.f32 %v2440_v7, %v4375_v48  ;;  %v2072_v13 = vpop.f32.mrb[11].mxu1 }
 0x301   :  { %v1908_v24 = vadd.f32 %v2389_v50, %v4375_v48  ;;  %v1902_v58 = vpop.f32.mrb[9].mxu0  ;;  %v2073_v15 = vadd.f32 %v4375_v48, %v2072_v13 }
 0x302   :  { %2224 = vst [vmem:[#allocation2 + $0x158] sm:$0xff] %v2078_v54  ;;  %v1903_v46 = vadd.f32 %v4375_v48, %v1902_v58 }
 0x303   :  { %2190 = vst [vmem:[#allocation2 + $0x48] sm:$0xff] %v1908_v24  ;;  %2223 = vst [vmem:[#allocation2 + $0x150] sm:$0xff] %v2073_v15 }
 0x304   :  { %2189 = vst [vmem:[#allocation2 + $0x40] sm:$0xff] %v1903_v46  ;;  %v2392_v19 = vpop.f32.mrb[10].mxu0 }
 0x305   :  { %v1918_v23 = vadd.f32 %v2392_v19, %v4375_v48  ;;  %v1912_v20 = vpop.f32.mrb[11].mxu0 }
 0x306   :  { %v1913_v12 = vadd.f32 %v4375_v48, %v1912_v20 }
 0x307   :  { %2192 = vst [vmem:[#allocation2 + $0x58] sm:$0xff] %v1918_v23 }
 0x308   :  { %2191 = vst [vmem:[#allocation2 + $0x50] sm:$0xff] %v1913_v12 }
 0x30a   :  { %v2395_v21 = vpop.f32.mrb[12].mxu0 }
 0x30b   :  { %v1928_v2 = vadd.f32 %v2395_v21, %v4375_v48  ;;  %v1922_v36 = vpop.f32.mrb[13].mxu0 }
 0x30c   :  { %v1923_v44 = vadd.f32 %v4375_v48, %v1922_v36 }
 0x30d   :  { %2194 = vst [vmem:[#allocation2 + $0x68] sm:$0xff] %v1928_v2 }
 0x30e   :  { %2193 = vst [vmem:[#allocation2 + $0x60] sm:$0xff] %v1923_v44 }
 0x311   :  { %v2443_v40 = vpop.f32.mrb[12].mxu1 }
 0x312   :  { %v2088_v16 = vadd.f32 %v2443_v40, %v4375_v48  ;;  %v2082_v27 = vpop.f32.mrb[13].mxu1 }
 0x313   :  { %v2083_v59 = vadd.f32 %v4375_v48, %v2082_v27 }
 0x314   :  { %2226 = vst [vmem:[#allocation2 + $0x168] sm:$0xff] %v2088_v16 }
 0x315   :  { %2225 = vst [vmem:[#allocation2 + $0x160] sm:$0xff] %v2083_v59 }
 0x31c   :  { %v2398_v18 = vpop.f32.mrb[14].mxu0 }
 0x31d   :  { %v1938_v9 = vadd.f32 %v2398_v18, %v4375_v48  ;;  %v1932_v37 = vpop.f32.mrb[15].mxu0 }
 0x31e   :  { %v1933_v56 = vadd.f32 %v4375_v48, %v1932_v37 }
 0x31f   :  { %2196 = vst [vmem:[#allocation2 + $0x78] sm:$0xff] %v1938_v9 }
 0x320   :  { %2195 = vst [vmem:[#allocation2 + $0x70] sm:$0xff] %v1933_v56 }
 0x323   :  { %v2446_v8 = vpop.f32.mrb[14].mxu1 }
 0x324   :  { %v2098_v57 = vadd.f32 %v2446_v8, %v4375_v48  ;;  %v2092_v41 = vpop.f32.mrb[15].mxu1 }
 0x325   :  { %v2093_v34 = vadd.f32 %v4375_v48, %v2092_v41 }
 0x326   :  { %2228 = vst [vmem:[#allocation2 + $0x178] sm:$0xff] %v2098_v57 }
 0x327   :  { %2227 = vst [vmem:[#allocation2 + $0x170] sm:$0xff] %v2093_v34 }
 0x32e   :  { %v2401_v11 = vpop.f32.mrb[16].mxu0 }
 0x32f   :  { %v1948_v35 = vadd.f32 %v2401_v11, %v4375_v48  ;;  %v1942_v31 = vpop.f32.mrb[17].mxu0 }
 0x330   :  { %v1943_v39 = vadd.f32 %v4375_v48, %v1942_v31 }
 0x331   :  { %2198 = vst [vmem:[#allocation2 + $0x88] sm:$0xff] %v1948_v35 }
 0x332   :  { %2197 = vst [vmem:[#allocation2 + $0x80] sm:$0xff] %v1943_v39 }
 0x335   :  { %v2449_v3 = vpop.f32.mrb[16].mxu1 }
 0x336   :  { %v2108_v60 = vadd.f32 %v2449_v3, %v4375_v48  ;;  %v2102_v30 = vpop.f32.mrb[17].mxu1 }
 0x337   :  { %v2103_v1 = vadd.f32 %v4375_v48, %v2102_v30 }
 0x338   :  { %2230 = vst [vmem:[#allocation2 + $0x188] sm:$0xff] %v2108_v60 }
 0x339   :  { %2229 = vst [vmem:[#allocation2 + $0x180] sm:$0xff] %v2103_v1 }
 0x340   :  { %v2404_v33 = vpop.f32.mrb[18].mxu0 }
 0x341   :  { %v1958_v29 = vadd.f32 %v2404_v33, %v4375_v48  ;;  %v1952_v0 = vpop.f32.mrb[19].mxu0 }
 0x342   :  { %v1953_v25 = vadd.f32 %v4375_v48, %v1952_v0 }
 0x343   :  { %2200 = vst [vmem:[#allocation2 + $0x98] sm:$0xff] %v1958_v29 }
 0x344   :  { %2199 = vst [vmem:[#allocation2 + $0x90] sm:$0xff] %v1953_v25 }
 0x347   :  { %v2452_v62 = vpop.f32.mrb[18].mxu1 }
 0x348   :  { %v2118_v53 = vadd.f32 %v2452_v62, %v4375_v48  ;;  %v2112_v4 = vpop.f32.mrb[19].mxu1 }
 0x349   :  { %v2113_v6 = vadd.f32 %v4375_v48, %v2112_v4 }
 0x34a   :  { %2232 = vst [vmem:[#allocation2 + $0x198] sm:$0xff] %v2118_v53 }
 0x34b   :  { %2231 = vst [vmem:[#allocation2 + $0x190] sm:$0xff] %v2113_v6 }
 0x352   :  { %v2407_v17 = vpop.f32.mrb[20].mxu0 }
 0x353   :  { %v1968_v47 = vadd.f32 %v2407_v17, %v4375_v48  ;;  %v1962_v32 = vpop.f32.mrb[21].mxu0 }
 0x354   :  { %v1963_v10 = vadd.f32 %v4375_v48, %v1962_v32 }
 0x355   :  { %2202 = vst [vmem:[#allocation2 + $0xa8] sm:$0xff] %v1968_v47 }
 0x356   :  { %2201 = vst [vmem:[#allocation2 + $0xa0] sm:$0xff] %v1963_v10 }
 0x359   :  { %v2455_v63 = vpop.f32.mrb[20].mxu1 }
 0x35a   :  { %v2128_v52 = vadd.f32 %v2455_v63, %v4375_v48  ;;  %v2122_v55 = vpop.f32.mrb[21].mxu1 }
 0x35b   :  { %v2123_v22 = vadd.f32 %v4375_v48, %v2122_v55 }
 0x35c   :  { %2234 = vst [vmem:[#allocation2 + $0x1a8] sm:$0xff] %v2128_v52 }
 0x35d   :  { %2233 = vst [vmem:[#allocation2 + $0x1a0] sm:$0xff] %v2123_v22 }
 0x364   :  { %v2410_v26 = vpop.f32.mrb[22].mxu0 }
 0x365   :  { %v1978_v42 = vadd.f32 %v2410_v26, %v4375_v48  ;;  %v1972_v61 = vpop.f32.mrb[23].mxu0 }
 0x366   :  { %v1973_v14 = vadd.f32 %v4375_v48, %v1972_v61 }
 0x367   :  { %2204 = vst [vmem:[#allocation2 + $0xb8] sm:$0xff] %v1978_v42 }
 0x368   :  { %2203 = vst [vmem:[#allocation2 + $0xb0] sm:$0xff] %v1973_v14 }
 0x36b   :  { %v2458_v43 = vpop.f32.mrb[22].mxu1 }
 0x36c   :  { %v2138_v49 = vadd.f32 %v2458_v43, %v4375_v48  ;;  %v2132_v28 = vpop.f32.mrb[23].mxu1 }
 0x36d   :  { %v2133_v45 = vadd.f32 %v4375_v48, %v2132_v28 }
 0x36e   :  { %2236 = vst [vmem:[#allocation2 + $0x1b8] sm:$0xff] %v2138_v49 }
 0x36f   :  { %2235 = vst [vmem:[#allocation2 + $0x1b0] sm:$0xff] %v2133_v45 }
 0x376   :  { %v2413_v38 = vpop.f32.mrb[24].mxu0 }
 0x377   :  { %v1988_v5 = vadd.f32 %v2413_v38, %v4375_v48  ;;  %v1982_v51 = vpop.f32.mrb[25].mxu0 }
 0x378   :  { %v1983_v7 = vadd.f32 %v4375_v48, %v1982_v51 }
 0x379   :  { %2206 = vst [vmem:[#allocation2 + $0xc8] sm:$0xff] %v1988_v5 }
 0x37a   :  { %2205 = vst [vmem:[#allocation2 + $0xc0] sm:$0xff] %v1983_v7 }
 0x37d   :  { %v2461_v50 = vpop.f32.mrb[24].mxu1 }
 0x37e   :  { %v2148_v54 = vadd.f32 %v2461_v50, %v4375_v48  ;;  %v2142_v13 = vpop.f32.mrb[25].mxu1 }
 0x37f   :  { %v2143_v24 = vadd.f32 %v4375_v48, %v2142_v13 }
 0x380   :  { %2238 = vst [vmem:[#allocation2 + $0x1c8] sm:$0xff] %v2148_v54 }
 0x381   :  { %2237 = vst [vmem:[#allocation2 + $0x1c0] sm:$0xff] %v2143_v24 }
 0x388   :  { %v2416_v58 = vpop.f32.mrb[26].mxu0 }
 0x389   :  { %v1998_v15 = vadd.f32 %v2416_v58, %v4375_v48  ;;  %v1992_v46 = vpop.f32.mrb[27].mxu0 }
 0x38a   :  { %v1993_v19 = vadd.f32 %v4375_v48, %v1992_v46 }
 0x38b   :  { %2208 = vst [vmem:[#allocation2 + $0xd8] sm:$0xff] %v1998_v15 }
 0x38c   :  { %2207 = vst [vmem:[#allocation2 + $0xd0] sm:$0xff] %v1993_v19 }
 0x38f   :  { %v2464_v23 = vpop.f32.mrb[26].mxu1 }
 0x390   :  { %v2158_v20 = vadd.f32 %v2464_v23, %v4375_v48  ;;  %v2152_v12 = vpop.f32.mrb[27].mxu1 }
 0x391   :  { %v2153_v21 = vadd.f32 %v4375_v48, %v2152_v12 }
 0x392   :  { %2240 = vst [vmem:[#allocation2 + $0x1d8] sm:$0xff] %v2158_v20 }
 0x393   :  { %2239 = vst [vmem:[#allocation2 + $0x1d0] sm:$0xff] %v2153_v21 }
 0x39a   :  { %v2419_v2 = vpop.f32.mrb[28].mxu0 }
 0x39b   :  { %v2008_v36 = vadd.f32 %v2419_v2, %v4375_v48  ;;  %v2002_v44 = vpop.f32.mrb[29].mxu0 }
 0x39c   :  { %v2003_v40 = vadd.f32 %v4375_v48, %v2002_v44 }
 0x39d   :  { %2210 = vst [vmem:[#allocation2 + $0xe8] sm:$0xff] %v2008_v36 }
 0x39e   :  { %2209 = vst [vmem:[#allocation2 + $0xe0] sm:$0xff] %v2003_v40 }
 0x3a1   :  { %v2467_v16 = vpop.f32.mrb[28].mxu1 }
 0x3a2   :  { %v2168_v27 = vadd.f32 %v2467_v16, %v4375_v48  ;;  %v2162_v59 = vpop.f32.mrb[29].mxu1 }
 0x3a3   :  { %v2163_v18 = vadd.f32 %v4375_v48, %v2162_v59 }
 0x3a4   :  { %2242 = vst [vmem:[#allocation2 + $0x1e8] sm:$0xff] %v2168_v27 }
 0x3a5   :  { %2241 = vst [vmem:[#allocation2 + $0x1e0] sm:$0xff] %v2163_v18 }
 0x3ac   :  { %v2422_v9 = vpop.f32.mrb[30].mxu0 }
 0x3ad   :  { %v2018_v37 = vadd.f32 %v2422_v9, %v4375_v48  ;;  %v2012_v56 = vpop.f32.mrb[31].mxu0 }
 0x3ae   :  { %v2013_v8 = vadd.f32 %v4375_v48, %v2012_v56 }
 0x3af   :  { %2212 = vst [vmem:[#allocation2 + $0xf8] sm:$0xff] %v2018_v37 }
 0x3b0   :  { %2211 = vst [vmem:[#allocation2 + $0xf0] sm:$0xff] %v2013_v8 }
 0x3b3   :  { %v2470_v57 = vpop.f32.mrb[30].mxu1 }
 0x3b4   :  { %v2178_v41 = vadd.f32 %v2470_v57, %v4375_v48  ;;  %v2172_v34 = vpop.f32.mrb[31].mxu1 }
 0x3b5   :  { %v2173_v11 = vadd.f32 %v4375_v48, %v2172_v34 }
 0x3b6   :  { %2244 = vst [vmem:[#allocation2 + $0x1f8] sm:$0xff] %v2178_v41 }
 0x3b7   :  { %2243 = vst [vmem:[#allocation2 + $0x1f0] sm:$0xff] %v2173_v11 }
 0x3b8   :  { %2716 = shalt.err (!%p2713_p4)
}
 0x3b9   :  { %s2717_s20 = scalar_lea.hbm %s4494_s5, 8192 }
 0x3ba   :  { %p2718_p5 = scmp.ne.s32.totalorder %s4494_s5, %s2717_s20  ;;  %p2721_p6 = scmp.lt.u32.totalorder %s2717_s20, %s4494_s5 }
 0x3bc   :  { %p2723_p7 = pnand %p2721_p6, %p2718_p5 }
 0x3be   :  { %2726 = shalt.err (!%p2723_p7)
}
 0x3bf   :  { %s2734_s25 = smov 128   ;;  %s2735_s26 = smov 8  }
 0x3c0   :  { %2256 = dma.vmem_to_hbm [thread:$0]  %s2251_s16, 8192, %s4494_s5, [#allocation3], %s2734_s25, %s2734_s25, %s2735_s26  }
 0x3c1   :  { %2727 = dma.done.wait [#allocation3], 8192  }
 0x3c2   :  { %2728 = vsyncadd [#allocation3], 4294959104 }
 0x3c3   :  { %2260 = vsyncpa [#allocation3], 1 }

</bundles_post_ra>
